<compile_context>
chip_gen: v6e
topology: v6e:2x2x1
jax: 0.10.0
libtpu: 0.0.40
codegen_flags: <defaults>
</compile_context>

<pallas_src>
import functools

import jax
import jax.numpy as jnp
from jax.experimental import pallas as pl
from jax.experimental.pallas import tpu as pltpu

LANE = 128        # lane width: hidden / class dims are zero-padded to this
NEG_BIG = -1e30   # bias on padded class lanes -> exp() underflows to 0 in softmax


def _round_up(v, m):
    return ((v + m - 1) // m) * m


# ----------------------------- Pallas kernel --------------------------------
def _fused_gcn_kernel(a_ref, x_ref, w1_ref, b1_ref, w2_ref, b2_ref, o_ref,
                      proj_ref, h1_ref, *, tm):
    """Both GCN layers in one kernel.

    grid = (2, num_row_tiles): axis 0 is the layer phase, axis 1 tiles node rows.
    The dense projection (X @ W1 in phase 0, H1 @ W2 in phase 1) is computed once
    per phase into proj_ref; each row tile then only runs the A_hat row-slab
    matmul (bf16 MXU, f32 accumulation) plus fused bias/ReLU/log_softmax.
    """
    phase = pl.program_id(0)
    i = pl.program_id(1)

    # ---- one-time per-phase projection into the shared VMEM scratch (MXU) ----
    @pl.when((phase == 0) & (i == 0))
    def _():
        proj_ref[...] = jnp.dot(
            x_ref[...], w1_ref[...],
            preferred_element_type=jnp.float32).astype(proj_ref.dtype)

    @pl.when((phase == 1) & (i == 0))
    def _():
        proj_ref[...] = jnp.dot(
            h1_ref[...], w2_ref[...],
            preferred_element_type=jnp.float32).astype(proj_ref.dtype)

    # ---- row-slab aggregation: A_hat[tile, :] @ proj   (bf16 -> f32 accum) ----
    agg = jnp.dot(a_ref[...], proj_ref[...], preferred_element_type=jnp.float32)

    @pl.when(phase == 0)
    def _():
        h = jnp.maximum(agg + b1_ref[...], 0.0)          # bias + ReLU (VPU, f32)
        r0 = pl.multiple_of(i * tm, tm)
        h1_ref[pl.ds(r0, tm), :] = h.astype(h1_ref.dtype)
        o_ref[...] = jnp.zeros_like(o_ref)               # placeholder; overwritten in phase 1

    @pl.when(phase == 1)
    def _():
        logits = agg + b2_ref[...]                       # padded lanes get -1e30 bias
        m = jnp.max(logits, axis=-1, keepdims=True)
        lse = m + jnp.log(jnp.sum(jnp.exp(logits - m), axis=-1, keepdims=True))
        o_ref[...] = (logits - lse).astype(o_ref.dtype)


def gcn2_forward(a_hat, x, w1, b1, w2, b2, *, tm=128):
    """Fused conv1 -> relu -> conv2 -> log_softmax via one pallas_call."""
    n, f = x.shape
    h = w1.shape[1]
    c = w2.shape[1]

    n_pad = _round_up(n, tm)                              # pad node count to tile multiple
    pw = max(LANE, _round_up(h, LANE), _round_up(c, LANE))  # shared padded lane width

    # bf16 inputs halve the dominant (N^2) HBM/VMEM traffic; accumulation is f32.
    a_p = jnp.zeros((n_pad, n_pad), jnp.bfloat16).at[:n, :n].set(a_hat.astype(jnp.bfloat16))
    x_p = jnp.zeros((n_pad, f), jnp.bfloat16).at[:n, :].set(x.astype(jnp.bfloat16))
    w1_p = jnp.zeros((f, pw), jnp.bfloat16).at[:, :h].set(w1.astype(jnp.bfloat16))
    b1_p = jnp.zeros((1, pw), jnp.float32).at[0, :h].set(b1)
    w2_p = jnp.zeros((pw, pw), jnp.bfloat16).at[:h, :c].set(w2.astype(jnp.bfloat16))
    b2_p = jnp.full((1, pw), NEG_BIG, jnp.float32).at[0, :c].set(b2)

    n_tiles = n_pad // tm

    flops = (2 * n_pad * f * pw          # X @ W1
             + 2 * n_pad * n_pad * pw    # A_hat @ XW1
             + 2 * n_pad * pw * pw       # H1 @ W2
             + 2 * n_pad * n_pad * pw)   # A_hat @ H1W2
    bytes_accessed = (2 * n_pad * n_pad * 2      # A_hat streamed in both phases (bf16)
                      + n_pad * f * 2 + f * pw * 2 + pw * pw * 2
                      + 2 * pw * 4
                      + 2 * n_pad * pw * 4)      # output (written in both phases)
    cost = pl.CostEstimate(flops=flops,
                           transcendentals=n_pad * pw + n_pad,
                           bytes_accessed=bytes_accessed)

    kernel = functools.partial(_fused_gcn_kernel, tm=tm)

    out_p = pl.pallas_call(
        kernel,
        out_shape=jax.ShapeDtypeStruct((n_pad, pw), jnp.float32),
        grid=(2, n_tiles),
        in_specs=[
            pl.BlockSpec((tm, n_pad), lambda p, i: (i, 0)),   # A_hat row slab (pipelined)
            pl.BlockSpec((n_pad, f), lambda p, i: (0, 0)),    # X   (resident)
            pl.BlockSpec((f, pw), lambda p, i: (0, 0)),       # W1  (resident)
            pl.BlockSpec((1, pw), lambda p, i: (0, 0)),       # b1  (resident)
            pl.BlockSpec((pw, pw), lambda p, i: (0, 0)),      # W2  (resident)
            pl.BlockSpec((1, pw), lambda p, i: (0, 0)),       # b2  (resident)
        ],
        out_specs=pl.BlockSpec((tm, pw), lambda p, i: (i, 0)),
        scratch_shapes=[
            pltpu.VMEM((n_pad, pw), jnp.bfloat16),   # proj: X@W1 (phase 0) / H1@W2 (phase 1)
            pltpu.VMEM((n_pad, pw), jnp.bfloat16),   # H1 activations (fused intermediate)
        ],
        compiler_params=pltpu.CompilerParams(
            # Both axes carry dependencies through the shared VMEM scratch
            # (phase 0 fills what phase 1 reads; tile 0 fills what later tiles
            # read), so they must stay "arbitrary" — fusion trades away the
            # megacore split in exchange for removing the HBM round-trip.
            dimension_semantics=("arbitrary", "arbitrary"),
            vmem_limit_bytes=64 * 1024 * 1024,
        ),
        cost_estimate=cost,
    )(a_p, x_p, w1_p, b1_p, w2_p, b2_p)

    return out_p[:n, :c]


# ------------------------------ plain-JAX glue -------------------------------
def build_normalized_adjacency(edge_index, num_nodes):
    """A_hat = D^-1/2 (A + I) D^-1/2 from COO edge_index [2, E] (GCNConv norm)."""
    src, dst = edge_index[0], edge_index[1]
    a = jnp.zeros((num_nodes, num_nodes), jnp.float32)
    # message flows src -> dst:  row = dst (target), col = src (source)
    a = a.at[dst, src].add(1.0)
    # TODO(synk): PyG adds self-loops only where missing; edge list here has none.
    a = a + jnp.eye(num_nodes, dtype=jnp.float32)
    deg = jnp.sum(a, axis=1)
    d_inv_sqrt = jnp.where(deg > 0, 1.0 / jnp.sqrt(deg), 0.0)
    return d_inv_sqrt[:, None] * a * d_inv_sqrt[None, :]


def glorot(key, shape):
    fan_in, fan_out = shape
    limit = jnp.sqrt(6.0 / (fan_in + fan_out))
    return jax.random.uniform(key, shape, jnp.float32, -limit, limit)


def net_forward(params, x, a_hat):
    """Net.forward: conv1 -> relu -> dropout(eval: identity) -> conv2 -> log_softmax."""
    # TODO(synk): F.dropout(x, training=self.training) — inference mode, identity.
    return gcn2_forward(a_hat, x, params["w1"], params["b1"],
                        params["w2"], params["b2"])


def net_forward_reference(params, x, a_hat):
    """Pure-JAX f32 reference for correctness checking."""
    h = jnp.maximum(a_hat @ (x @ params["w1"]) + params["b1"], 0.0)
    logits = a_hat @ (h @ params["w2"]) + params["b2"]
    return jax.nn.log_softmax(logits, axis=-1)


# --------------------------------- driver ------------------------------------
if __name__ == "__main__":
    # Small synthetic "Cora-like" problem (sized so the row grid has >1 tile).
    N_NODES = 256          # number of graph nodes
    N_FEATURES = 64        # dataset.num_features
    HIDDEN = 16            # GCNConv hidden size (from the module)
    N_CLASSES = 8          # dataset.num_classes

    key = jax.random.PRNGKey(0)
    k_x, k_e, k_w1, k_w2 = jax.random.split(key, 4)

    # Node features.
    x = jax.random.normal(k_x, (N_NODES, N_FEATURES), jnp.float32)

    # Deterministic edge list: a ring (both directions) + a few random edges.
    ring_src = jnp.arange(N_NODES, dtype=jnp.int32)
    ring_dst = (ring_src + 1) % N_NODES
    rand = jax.random.randint(k_e, (2, 64), 0, N_NODES, dtype=jnp.int32)
    src = jnp.concatenate([ring_src, ring_dst, rand[0], rand[1]])
    dst = jnp.concatenate([ring_dst, ring_src, rand[1], rand[0]])
    edge_index = jnp.stack([src, dst])                      # [2, E]

    a_hat = build_normalized_adjacency(edge_index, N_NODES)

    # Parameters (PyG GCNConv default: glorot weight, zero bias).
    params = {
        "w1": glorot(k_w1, (N_FEATURES, HIDDEN)),
        "b1": jnp.zeros((HIDDEN,), jnp.float32),
        "w2": glorot(k_w2, (HIDDEN, N_CLASSES)),
        "b2": jnp.zeros((N_CLASSES,), jnp.float32),
    }

    out = net_forward(params, x, a_hat)
    out = jax.block_until_ready(out)

    assert out.shape == (N_NODES, N_CLASSES)
    # log_softmax rows must exponentiate-sum to ~1
    assert jnp.allclose(jnp.sum(jnp.exp(out), axis=1), 1.0, atol=1e-3)
    # match the pure-JAX f32 reference (bf16 inputs -> loose tolerance)
    ref = jax.block_until_ready(net_forward_reference(params, x, a_hat))
    assert jnp.allclose(out, ref, atol=1e-1, rtol=1e-1)
    print("KERNEL_OK")
</pallas_src>

<mosaic_0001>
module attributes {stable_mosaic.version = 11 : i64} {
  func.func @_fused_gcn_kernel(%arg0: i32, %arg1: i32, %arg2: memref<128x256xbf16, #tpu.memory_space<vmem>>, %arg3: memref<256x64xbf16, #tpu.memory_space<vmem>>, %arg4: memref<64x128xbf16, #tpu.memory_space<vmem>>, %arg5: memref<1x128xf32, #tpu.memory_space<vmem>>, %arg6: memref<128x128xbf16, #tpu.memory_space<vmem>>, %arg7: memref<1x128xf32, #tpu.memory_space<vmem>>, %arg8: memref<128x128xf32, #tpu.memory_space<vmem>>, %arg9: memref<256x128xbf16, #tpu.memory_space<vmem>>, %arg10: memref<256x128xbf16, #tpu.memory_space<vmem>>) attributes {dimension_semantics = [#tpu.dimension_semantics<arbitrary>, #tpu.dimension_semantics<arbitrary>], iteration_bounds = array<i64: 2, 2>, scalar_prefetch = 0 : i64, scratch_operands = 2 : i64, tpu.core_type = #tpu.core_type<tc>, window_params = [{transform_indices = @transform_0, window_bounds = array<i64: 128, 256>}, {pipeline_mode = #tpu.pipeline_mode<synchronous>, transform_indices = @transform_1, window_bounds = array<i64: 256, 64>}, {pipeline_mode = #tpu.pipeline_mode<synchronous>, transform_indices = @transform_2, window_bounds = array<i64: 64, 128>}, {pipeline_mode = #tpu.pipeline_mode<synchronous>, transform_indices = @transform_3, window_bounds = array<i64: 1, 128>}, {pipeline_mode = #tpu.pipeline_mode<synchronous>, transform_indices = @transform_4, window_bounds = array<i64: 128, 128>}, {pipeline_mode = #tpu.pipeline_mode<synchronous>, transform_indices = @transform_5, window_bounds = array<i64: 1, 128>}, {transform_indices = @transform_6, window_bounds = array<i64: 128, 128>}]} {
    %c0_i32 = arith.constant 0 : i32
    %0 = arith.cmpi eq, %arg0, %c0_i32 : i32
    %c0_i32_0 = arith.constant 0 : i32
    %1 = arith.cmpi eq, %arg1, %c0_i32_0 : i32
    %2 = arith.andi %0, %1 : i1
    %3 = arith.extui %2 : i1 to i32
    %c0_i32_1 = arith.constant 0 : i32
    %4 = arith.cmpi ne, %3, %c0_i32_1 : i32
    scf.if %4 {
      %c0_11 = arith.constant 0 : index
      %c0_12 = arith.constant 0 : index
      %19 = vector.load %arg3[%c0_11, %c0_12] : memref<256x64xbf16, #tpu.memory_space<vmem>>, vector<256x64xbf16>
      %c0_13 = arith.constant 0 : index
      %c0_14 = arith.constant 0 : index
      %20 = vector.load %arg4[%c0_13, %c0_14] : memref<64x128xbf16, #tpu.memory_space<vmem>>, vector<64x128xbf16>
      %cst_15 = arith.constant dense<0.000000e+00> : vector<256x128xf32>
      %21 = tpu.matmul %19, %20, %cst_15 {dimension_numbers = #tpu.dot_dimension_numbers<[1], [0], [0], [1], [0, 0, 1, 1], [], []>} : vector<256x64xbf16>, vector<64x128xbf16>, vector<256x128xf32> -> vector<256x128xf32>
      %22 = arith.truncf %21 : vector<256x128xf32> to vector<256x128xbf16>
      %c0_16 = arith.constant 0 : index
      %c0_17 = arith.constant 0 : index
      %23 = vector.load %arg9[%c0_16, %c0_17] : memref<256x128xbf16, #tpu.memory_space<vmem>>, vector<256x128xbf16>
      tpu.vector_store %arg9[%c0_16, %c0_17], %22 {strides = array<i32>} : memref<256x128xbf16, #tpu.memory_space<vmem>>, vector<256x128xbf16>,
    } else {
    }
    %c1_i32 = arith.constant 1 : i32
    %5 = arith.cmpi eq, %arg0, %c1_i32 : i32
    %c0_i32_2 = arith.constant 0 : i32
    %6 = arith.cmpi eq, %arg1, %c0_i32_2 : i32
    %7 = arith.andi %5, %6 : i1
    %8 = arith.extui %7 : i1 to i32
    %c0_i32_3 = arith.constant 0 : i32
    %9 = arith.cmpi ne, %8, %c0_i32_3 : i32
    scf.if %9 {
      %c0_11 = arith.constant 0 : index
      %c0_12 = arith.constant 0 : index
      %19 = vector.load %arg10[%c0_11, %c0_12] : memref<256x128xbf16, #tpu.memory_space<vmem>>, vector<256x128xbf16>
      %c0_13 = arith.constant 0 : index
      %c0_14 = arith.constant 0 : index
      %20 = vector.load %arg6[%c0_13, %c0_14] : memref<128x128xbf16, #tpu.memory_space<vmem>>, vector<128x128xbf16>
      %cst_15 = arith.constant dense<0.000000e+00> : vector<256x128xf32>
      %21 = tpu.matmul %19, %20, %cst_15 {dimension_numbers = #tpu.dot_dimension_numbers<[1], [0], [0], [1], [0, 0, 1, 1], [], []>} : vector<256x128xbf16>, vector<128x128xbf16>, vector<256x128xf32> -> vector<256x128xf32>
      %22 = arith.truncf %21 : vector<256x128xf32> to vector<256x128xbf16>
      %c0_16 = arith.constant 0 : index
      %c0_17 = arith.constant 0 : index
      %23 = vector.load %arg9[%c0_16, %c0_17] : memref<256x128xbf16, #tpu.memory_space<vmem>>, vector<256x128xbf16>
      tpu.vector_store %arg9[%c0_16, %c0_17], %22 {strides = array<i32>} : memref<256x128xbf16, #tpu.memory_space<vmem>>, vector<256x128xbf16>,
    } else {
    }
    %c0 = arith.constant 0 : index
    %c0_4 = arith.constant 0 : index
    %10 = vector.load %arg2[%c0, %c0_4] : memref<128x256xbf16, #tpu.memory_space<vmem>>, vector<128x256xbf16>
    %c0_5 = arith.constant 0 : index
    %c0_6 = arith.constant 0 : index
    %11 = vector.load %arg9[%c0_5, %c0_6] : memref<256x128xbf16, #tpu.memory_space<vmem>>, vector<256x128xbf16>
    %cst = arith.constant dense<0.000000e+00> : vector<128x128xf32>
    %12 = tpu.matmul %10, %11, %cst {dimension_numbers = #tpu.dot_dimension_numbers<[1], [0], [0], [1], [0, 0, 1, 1], [], []>} : vector<128x256xbf16>, vector<256x128xbf16>, vector<128x128xf32> -> vector<128x128xf32>
    %c0_i32_7 = arith.constant 0 : i32
    %13 = arith.cmpi eq, %arg0, %c0_i32_7 : i32
    %14 = arith.extui %13 : i1 to i32
    %c0_i32_8 = arith.constant 0 : i32
    %15 = arith.cmpi ne, %14, %c0_i32_8 : i32
    scf.if %15 {
      %c0_11 = arith.constant 0 : index
      %c0_12 = arith.constant 0 : index
      %19 = vector.load %arg5[%c0_11, %c0_12] : memref<1x128xf32, #tpu.memory_space<vmem>>, vector<1x128xf32>
      %20 = vector.broadcast %19 : vector<1x128xf32> to vector<128x128xf32>
      %21 = arith.addf %12, %20 : vector<128x128xf32>
      %cst_13 = arith.constant 0.000000e+00 : f32
      %22 = vector.broadcast %cst_13 : f32 to vector<128x128xf32>
      %23 = arith.maximumf %21, %22 : vector<128x128xf32>
      %c128_i32 = arith.constant 128 : i32
      %24 = arith.muli %arg1, %c128_i32 : i32
      %25 = tpu.assume_multiple %24, 128 : i32
      %26 = arith.truncf %23 : vector<128x128xf32> to vector<128x128xbf16>
      %27 = arith.index_cast %25 : i32 to index
      %c0_14 = arith.constant 0 : index
      %28 = vector.load %arg10[%27, %c0_14] : memref<256x128xbf16, #tpu.memory_space<vmem>>, vector<128x128xbf16>
      tpu.vector_store %arg10[%27, %c0_14], %26 {strides = array<i32>} : memref<256x128xbf16, #tpu.memory_space<vmem>>, vector<128x128xbf16>,
      %cst_15 = arith.constant 0.000000e+00 : f32
      %29 = vector.broadcast %cst_15 : f32 to vector<128x128xf32>
      %c0_16 = arith.constant 0 : index
      %c0_17 = arith.constant 0 : index
      %30 = vector.load %arg8[%c0_16, %c0_17] : memref<128x128xf32, #tpu.memory_space<vmem>>, vector<128x128xf32>
      tpu.vector_store %arg8[%c0_16, %c0_17], %29 {strides = array<i32>} : memref<128x128xf32, #tpu.memory_space<vmem>>, vector<128x128xf32>,
    } else {
    }
    %c1_i32_9 = arith.constant 1 : i32
    %16 = arith.cmpi eq, %arg0, %c1_i32_9 : i32
    %17 = arith.extui %16 : i1 to i32
    %c0_i32_10 = arith.constant 0 : i32
    %18 = arith.cmpi ne, %17, %c0_i32_10 : i32
    scf.if %18 {
      %c0_11 = arith.constant 0 : index
      %c0_12 = arith.constant 0 : index
      %19 = vector.load %arg7[%c0_11, %c0_12] : memref<1x128xf32, #tpu.memory_space<vmem>>, vector<1x128xf32>
      %20 = vector.broadcast %19 : vector<1x128xf32> to vector<128x128xf32>
      %21 = arith.addf %12, %20 : vector<128x128xf32>
      %cst_13 = arith.constant dense<0xFF800000> : vector<128xf32>
      %22 = vector.multi_reduction <maximumf>, %21, %cst_13 [1] : vector<128x128xf32> to vector<128xf32>
      %23 = vector.shape_cast %22 : vector<128xf32> to vector<128x1xf32>
      %24 = vector.broadcast %23 : vector<128x1xf32> to vector<128x128xf32>
      %25 = arith.subf %21, %24 : vector<128x128xf32>
      %26 = math.exp %25 : vector<128x128xf32>
      %cst_14 = arith.constant dense<0.000000e+00> : vector<128xf32>
      %27 = vector.multi_reduction <add>, %26, %cst_14 [1] : vector<128x128xf32> to vector<128xf32>
      %28 = vector.shape_cast %27 : vector<128xf32> to vector<128x1xf32>
      %29 = math.log %28 : vector<128x1xf32>
      %30 = arith.addf %23, %29 : vector<128x1xf32>
      %31 = vector.broadcast %30 : vector<128x1xf32> to vector<128x128xf32>
      %32 = arith.subf %21, %31 : vector<128x128xf32>
      %c0_15 = arith.constant 0 : index
      %c0_16 = arith.constant 0 : index
      %33 = vector.load %arg8[%c0_15, %c0_16] : memref<128x128xf32, #tpu.memory_space<vmem>>, vector<128x128xf32>
      tpu.vector_store %arg8[%c0_15, %c0_16], %32 {strides = array<i32>} : memref<128x128xf32, #tpu.memory_space<vmem>>, vector<128x128xf32>,
    } else {
    }
    return
  }
  func.func @transform_0(%arg0: i32, %arg1: i32) -> (i32, i32) {
    %c0_i32 = arith.constant 0 : i32
    %c0_i32_0 = arith.constant 0 : i32
    return %arg1, %c0_i32 : i32, i32
  }
  func.func @transform_1(%arg0: i32, %arg1: i32) -> (i32, i32) {
    %c0_i32 = arith.constant 0 : i32
    %c0_i32_0 = arith.constant 0 : i32
    %c0_i32_1 = arith.constant 0 : i32
    return %c0_i32, %c0_i32_0 : i32, i32
  }
  func.func @transform_2(%arg0: i32, %arg1: i32) -> (i32, i32) {
    %c0_i32 = arith.constant 0 : i32
    %c0_i32_0 = arith.constant 0 : i32
    %c0_i32_1 = arith.constant 0 : i32
    return %c0_i32, %c0_i32_0 : i32, i32
  }
  func.func @transform_3(%arg0: i32, %arg1: i32) -> (i32, i32) {
    %c0_i32 = arith.constant 0 : i32
    %c0_i32_0 = arith.constant 0 : i32
    %c0_i32_1 = arith.constant 0 : i32
    return %c0_i32, %c0_i32_0 : i32, i32
  }
  func.func @transform_4(%arg0: i32, %arg1: i32) -> (i32, i32) {
    %c0_i32 = arith.constant 0 : i32
    %c0_i32_0 = arith.constant 0 : i32
    %c0_i32_1 = arith.constant 0 : i32
    return %c0_i32, %c0_i32_0 : i32, i32
  }
  func.func @transform_5(%arg0: i32, %arg1: i32) -> (i32, i32) {
    %c0_i32 = arith.constant 0 : i32
    %c0_i32_0 = arith.constant 0 : i32
    %c0_i32_1 = arith.constant 0 : i32
    return %c0_i32, %c0_i32_0 : i32, i32
  }
  func.func @transform_6(%arg0: i32, %arg1: i32) -> (i32, i32) {
    %c0_i32 = arith.constant 0 : i32
    %c0_i32_0 = arith.constant 0 : i32
    return %arg1, %c0_i32 : i32, i32
  }
}

</mosaic_0001>

<bundles_post_ra>
// kernel: tpu_custom_call.1
= control target key start
LH: loop header
LB: loop body
LE: loop exit
PB: predicated region body
PF: predicated region fallthrough
CT: control target
= control target key end

     0   :  { %11 = vsyncpa [#allocation5], 0  ;;  %s3805_s0 = inlined_call_operand.hbm [shape: bf16[256,256], index: 0, kind: input, shape index: {}]   ;;  %s3806_s1 = inlined_call_operand.vmem [shape: bf16[256,64], index: 1, kind: input, shape index: {}]   ;;  %s3807_s2 = inlined_call_operand.vmem [shape: bf16[64,128], index: 2, kind: input, shape index: {}]   ;;  %s3808_s3 = inlined_call_operand.vmem [shape: f32[1,128], index: 3, kind: input, shape index: {}]   ;;  %s3809_s4 = inlined_call_operand.vmem [shape: bf16[128,128], index: 4, kind: input, shape index: {}]   ;;  %s3810_s5 = inlined_call_operand.vmem [shape: f32[1,128], index: 5, kind: input, shape index: {}]   ;;  %s3811_s6 = inlined_call_operand.hbm [shape: f32[256,128], index: 6, kind: output, shape index: {}]  }
   0x1   :  { %13 = vsyncpa [#allocation5 + $0x1], 0 }
   0x2   :  { %14 = vsyncpa [#allocation6], 0 }
   0x3   :  { %16 = vsyncpa [#allocation6 + $0x1], 0  ;;  %s3255_s21 = smov 0   ;;  %s3257_s22 = smov 0  }
   0x4   :  { %s3259_s23 = smov 0   ;;  %s3261_s24 = smov 0  }
   0x5   :  { %s3263_s25 = smov 0   ;;  %s3265_s26 = smov 0  }
   0x6   :  { %s3267_s27 = smov 0   ;;  %s3269_s28 = smov 0  }
   0x7 LB: > { %3814 = sst [smem:[#allocation10_spill]] %s3207_s27  ;;  %s2106_s29 = sadd.s32 4294967295, %s3211_s28   ;;  %s3211_s28 = sphi %s3269_s28, %s22_s28   ;;  %s3207_s27 = sphi %s3267_s27, %s3824_s27   ;;  %s3203_s26 = sphi %s3265_s26, %s3829_s26   ;;  %s3199_s25 = sphi %s3263_s25, %s3822_s25   ;;  %s3195_s24 = sphi %s3261_s24, %s3828_s24   ;;  %s3191_s23 = sphi %s3259_s23, %s3827_s23   ;;  %s3187_s22 = sphi %s3257_s22, %s3826_s22   ;;  %s3183_s21 = sphi %s3255_s21, %s3825_s21  }
   0x8   : > { %s2107_s30 = sadd.s32 4294967294, %s3211_s28   ;;  %s31_s7 = sadd.s32 1, %s3203_s26 }
   0x9   : > { %s34_s8 = sadd.s32 1, %s3207_s27  ;;  %p32_p0 = scmp.ge.s32.totalorder %s31_s7, 2 }
   0xa   : > { %s41_s9 = sadd.s32 1, %s3191_s23  ;;  %p48_p1 = scmp.ne.s32.totalorder %s3191_s23, %s3187_s22 }
   0xb   : > { %p49_p2 = scmp.eq.s32.totalorder %s3211_s28, 0  ;;  %s3831_s7 = smov (%p32_p0, %s31_s7), 0 }
   0xc   : > { %3815 = sst [smem:[#allocation11_spill]] %s3831_s7  ;;  %s3833_s8 = smov (!%p32_p0, %s34_s8), %s3207_s27 }
   0xd   : > { %s38_s10 = ssub.s32 %s3203_s26, %s3831_s7  ;;  %p3311_p3 = por %p49_p2, %p48_p1 }
   0xe   : > { %p36_p4 = scmp.ge.s32.totalorder %s3833_s8, 2  ;;  %p39_p5 = scmp.eq.s32.totalorder %s38_s10, 0 }
   0xf   : > { %p54_p6 = scmp.ne.s32.totalorder %s3187_s22, %s3183_s21  ;;  %p55_p7 = scmp.eq.s32.totalorder %s2106_s29, 0 }
  0x10   : > { %s3835_s8 = smov (%p36_p4, %s3833_s8), 0  ;;  %p183_p9 = scmp.eq.s32.totalorder %s2106_s29, 3 }
  0x11   : > { %3817 = sst [smem:[#allocation12_spill]] %s3835_s8  ;;  %p3322_p8 = por %p55_p7, %p54_p6 }
  0x12   : > { %s3320_s12 = scalar_select %p39_p5, %s3191_s23, %s41_s9  }
  0x13   : > { %p189_p10 = scmp.eq.s32.totalorder %s2107_s30, 3  ;;  %p3329_p11 = por %p183_p9, %p48_p1 }
  0x14   : > { %p2868_p12 = scmp.lt.s32.totalorder %s3211_s28, 4  ;;  %s224_s16 = sand.u32 1, %s3191_s23  }
  0x15   : > { %p3334_p13 = por %p189_p10, %p54_p6  ;;  %s2110_s17 = sshll.u32 %s224_s16, 7 }
  0x16   : > { %s2301_s18 = sshll.u32 %s3203_s26, 11  ;;  %s228_s10 = scalar_lea.vmem [#allocation4], %s2110_s17 }
  0x17   : > { %s235_s9 = scalar_lea.hbm %s3805_s0, %s2301_s18  ;;  %s236_s29 = sshll.u32 %s228_s10, 4  ;;  %s237_s29 = int_to_ptr.vmem [resolvable:$true] %s236_s29 }
  0x18   : > { %p3345_p0 = pnand %p2868_p12, %p3311_p3  ;;  %p2114_p1 = scmp.ge.s32.totalorder %s3211_s28, 1 }
  0x19   : > { %s225_s8 = scalar_lea.sflag [#allocation5], %s224_s16  ;;  %s3100_s7 = scalar_lea.vmem %s237_s29, 2048 }
  0x1a   : > { %p3089_p2 = pneg %p3345_p0  ;;  %p3101_p4 = scmp.ne.s32.totalorder %s237_s29, %s3100_s7 }
  0x1b   : > { %s3213_s27 = smov [#allocation4]  }
  0x1c   : > { %p3103_p5 = pnand %p3101_p4, %p3089_p2  ;;  %s3105_s19 = sshll.u32 %s3213_s27, 4  ;;  %s3106_s19 = int_to_ptr.vmem [resolvable:$false] %s3105_s19 }
  0x1d   : > { %s3107_s17 = scalar_lea.vmem %s3106_s19, 4096  ;;  %p3108_p7 = scmp.lt.s32.totalorder %s237_s29, %s3106_s19 }
  0x1e   : > { %p3104_p6 = pneg %p3103_p5  ;;  %p3109_p9 = scmp.lt.s32.totalorder %s3107_s17, %s3100_s7 }
  0x20   : > { %p3110_p10 = por %p3109_p9, %p3108_p7 }
  0x22   : > { %p3111_p3 = pnand %p3110_p10, %p3104_p6 }
  0x24   : > { %3114 = shalt.err (!%p3111_p3)
}
  0x25   : > { %s3214_s11 = smov 128   ;;  %s3215_s16 = smov 8  }
  0x26   : > { %2863 = dma.hbm_to_vmem [thread:$0]  (!%p3345_p0), %s235_s9, 2048, %s237_s29, %s225_s8, %s3214_s11, %s3214_s11, %s3215_s16  }
  0x27   : > { %p244_p12 = scmp.lt.s32.totalorder %s3211_s28, 5 }
  0x29   : > { %p245_p2 = pnand %p2114_p1, %p244_p12 }
  0x2a   : > { %s3358_s27 = sand.u32 (!%p245_p2), 1, %s3187_s22  }
  0x2b   : > { %248 = sbr.rel (%p245_p2) target bundleno = 1227 (0x4cb), region = 44  ;;  %s2115_s7 = sshll.u32 (!%p245_p2), %s3358_s27, 7 }
  0x2c   : > { %s251_s18 = scalar_lea.sflag (!%p245_p2), [#allocation5], %s3358_s27  ;;  %s3362_s20 = scalar_lea.vmem (!%p245_p2), [#allocation4], %s2115_s7 }
  0x30   : > { %3174 = dma.done.wait (%p3322_p8), %s251_s18, 2048  }
  0x31   : > { %3176 = vsyncadd (%p3322_p8), %s251_s18, 4294965248  ;;  %p286_p0 = scmp.eq.s32.totalorder %s3199_s25, 0  ;;  %p287_p1 = scmp.eq.s32.totalorder %s3195_s24, 0 }
  0x32   : > { %s3372_s8 = scalar_lea.vmem [#allocation7], %s2115_s7 }
  0x33   : > { %p288_p4 = pnand %p287_p1, %p286_p0 }
  0x35   : > { %291 = sbr.rel (%p288_p4) target bundleno = 301 (0x12d), region = 52 }
  0x3a   : > { %v2939_v0 = vld [vmem:[%s3807_s2 + $0x18] sm:$0xff]   ;;  %v2940_v1 = vld [vmem:[%s3807_s2 + $0x10] sm:$0xff]   ;;  %v2941_v2 = vld [vmem:[%s3807_s2 + $0x8] sm:$0xff]   ;;  %vm436_vm0 = vcmask 523264  }
  0x3b   : > { %2728 = vmatprep.subr.bf16.mxu0 %v2939_v0  ;;  %2816 = vmatprep.subr.bf16.mxu1 %v2939_v0  ;;  %v2943_v3 = vld [vmem:[%s3806_s1] sm:$0xff]   ;;  %v2945_v6 = vld [vmem:[%s3806_s1 + $0x8] sm:$0xff]   ;;  %v2947_v8 = vld [vmem:[%s3806_s1 + $0x10] sm:$0xff]  }
  0x3c   : > { %2729 = vmatpush3.bf16.msra.mxu0 %v2939_v0  ;;  %2820 = vmatpush3.bf16.msra.mxu1 %v2939_v0  ;;  %v2944_v4 = vld [vmem:[%s3806_s1 + $0x40] sm:$0xff]   ;;  %v2946_v7 = vld [vmem:[%s3806_s1 + $0x48] sm:$0xff]   ;;  %v2948_v9 = vld [vmem:[%s3806_s1 + $0x50] sm:$0xff]  }
  0x3d   : > { %2730 = vmatprep.subr.bf16.mxu0 %v2940_v1  ;;  %2817 = vmatprep.subr.bf16.mxu1 %v2940_v1  ;;  %v2942_v5 = vld [vmem:[%s3807_s2] sm:$0xff]   ;;  %v2949_v10 = vld [vmem:[%s3806_s1 + $0x18] sm:$0xff]   ;;  %v2953_v14 = vld [vmem:[%s3806_s1 + $0x28] sm:$0xff]  }
  0x3e   : > { %2736 = vmatprep.mubr.msk.bf16.mxu0 %vm436_vm0, %v2943_v3  ;;  %2752 = vmatprep.mubr.msk.bf16.mxu1 %vm436_vm0, %v2944_v4  ;;  %v2950_v11 = vld [vmem:[%s3806_s1 + $0x58] sm:$0xff]   ;;  %v2951_v12 = vld [vmem:[%s3806_s1 + $0x20] sm:$0xff]   ;;  %v2954_v15 = vld [vmem:[%s3806_s1 + $0x68] sm:$0xff]  }
  0x3f   : > { %v2952_v13 = vld [vmem:[%s3806_s1 + $0x60] sm:$0xff]   ;;  %v2955_v16 = vld [vmem:[%s3806_s1 + $0x30] sm:$0xff]   ;;  %v2957_v18 = vld [vmem:[%s3806_s1 + $0x38] sm:$0xff]  }
  0x40   : > { %2731 = vmatpush3.bf16.msra.mxu0 %v2940_v1  ;;  %2821 = vmatpush3.bf16.msra.mxu1 %v2940_v1  ;;  %v2956_v17 = vld [vmem:[%s3806_s1 + $0x70] sm:$0xff]   ;;  %v2958_v19 = vld [vmem:[%s3806_s1 + $0x78] sm:$0xff]  }
  0x41   : > { %2732 = vmatprep.subr.bf16.mxu0 %v2941_v2  ;;  %2818 = vmatprep.subr.bf16.mxu1 %v2941_v2 }
  0x44   : > { %2733 = vmatpush3.bf16.msra.mxu0 %v2941_v2  ;;  %2822 = vmatpush3.bf16.msra.mxu1 %v2941_v2 }
  0x45   : > { %2734 = vmatprep.subr.bf16.mxu0 %v2942_v5  ;;  %2819 = vmatprep.subr.bf16.mxu1 %v2942_v5 }
  0x48   : > { %2735 = vmatpush3.bf16.msra.mxu0 %v2942_v5  ;;  %2823 = vmatpush3.bf16.msra.mxu1 %v2942_v5 }
  0x4b   : > { %2737 = vmatmul.mubr.msk.bf16.vlgmr.msra.gmra.mxu0 %vm436_vm0, %v2945_v6  ;;  %2753 = vmatmul.mubr.msk.bf16.vlgmr.msra.gmra.mxu1 %vm436_vm0, %v2946_v7 }
  0x4c   : > { %2740 = vmatprep.mubr.msk.bf16.mxu0 %vm436_vm0, %v2947_v8  ;;  %2756 = vmatprep.mubr.msk.bf16.mxu1 %vm436_vm0, %v2948_v9 }
  0x53   : > { %2741 = vmatmul.mubr.msk.bf16.gmra.mxu0 %vm436_vm0, %v2949_v10  ;;  %2757 = vmatmul.mubr.msk.bf16.gmra.mxu1 %vm436_vm0, %v2950_v11 }
  0x54   : > { %2744 = vmatprep.mubr.msk.bf16.mxu0 %vm436_vm0, %v2951_v12  ;;  %2760 = vmatprep.mubr.msk.bf16.mxu1 %vm436_vm0, %v2952_v13 }
  0x5b   : > { %2745 = vmatmul.mubr.msk.bf16.gmra.mxu0 %vm436_vm0, %v2953_v14  ;;  %2761 = vmatmul.mubr.msk.bf16.gmra.mxu1 %vm436_vm0, %v2954_v15 }
  0x5c   : > { %2748 = vmatprep.mubr.msk.bf16.mxu0 %vm436_vm0, %v2955_v16  ;;  %2764 = vmatprep.mubr.msk.bf16.mxu1 %vm436_vm0, %v2956_v17 }
  0x63   : > { %2749 = vmatmul.mubr.msk.bf16.gmra.mxu0 %vm436_vm0, %v2957_v18  ;;  %2765 = vmatmul.mubr.msk.bf16.gmra.mxu1 %vm436_vm0, %v2958_v19 }
 0x10b   : > { %v2738_v20 = vpop.f32.mrf.mxu0  ;;  %v2754_v21 = vpop.f32.mrf.mxu1 }
 0x10d   : > { %v519_v22 = vpop.f32.mrf.mxu0  ;;  %v583_v23 = vpop.f32.mrf.mxu1 }
 0x10f   : > { %v2739_v24 = vpop.f32.mrf.mxu0  ;;  %v2755_v25 = vpop.f32.mrf.mxu1 }
 0x110   : > { %v2391_v26 = vpack.c.bf16 %v2739_v24, %v2738_v20  ;;  %v2431_v27 = vpack.c.bf16 %v2755_v25, %v2754_v21 }
 0x111   : > { %v522_v28 = vpop.f32.mrf.mxu0  ;;  %v586_v29 = vpop.f32.mrf.mxu1 }
 0x112   : > { %2583 = vst [vmem:[#allocation2 + $0x8] sm:$0xff] %v2391_v26   ;;  %2591 = vst [vmem:[#allocation2 + $0x48] sm:$0xff] %v2431_v27   ;;  %v2386_v30 = vpack.c.bf16 %v522_v28, %v519_v22  ;;  %v2426_v31 = vpack.c.bf16 %v586_v29, %v583_v23 }
 0x113   : > { %v2742_v32 = vpop.f32.mrf.mxu0  ;;  %v2758_v33 = vpop.f32.mrf.mxu1 }
 0x114   : > { %2387 = vst [vmem:[#allocation2] sm:$0xff] %v2386_v30   ;;  %2590 = vst [vmem:[#allocation2 + $0x40] sm:$0xff] %v2426_v31  }
 0x115   : > { %v535_v34 = vpop.f32.mrf.mxu0  ;;  %v599_v35 = vpop.f32.mrf.mxu1 }
 0x117   : > { %v2743_v36 = vpop.f32.mrf.mxu0  ;;  %v2759_v37 = vpop.f32.mrf.mxu1 }
 0x118   : > { %v2401_v38 = vpack.c.bf16 %v2743_v36, %v2742_v32  ;;  %v2441_v39 = vpack.c.bf16 %v2759_v37, %v2758_v33 }
 0x119   : > { %v538_v40 = vpop.f32.mrf.mxu0  ;;  %v602_v41 = vpop.f32.mrf.mxu1 }
 0x11a   : > { %2585 = vst [vmem:[#allocation2 + $0x18] sm:$0xff] %v2401_v38   ;;  %2593 = vst [vmem:[#allocation2 + $0x58] sm:$0xff] %v2441_v39   ;;  %v2396_v42 = vpack.c.bf16 %v538_v40, %v535_v34  ;;  %v2436_v43 = vpack.c.bf16 %v602_v41, %v599_v35 }
 0x11b   : > { %v2746_v44 = vpop.f32.mrf.mxu0  ;;  %v2762_v45 = vpop.f32.mrf.mxu1 }
 0x11c   : > { %2584 = vst [vmem:[#allocation2 + $0x10] sm:$0xff] %v2396_v42   ;;  %2592 = vst [vmem:[#allocation2 + $0x50] sm:$0xff] %v2436_v43  }
 0x11d   : > { %v551_v46 = vpop.f32.mrf.mxu0  ;;  %v615_v47 = vpop.f32.mrf.mxu1 }
 0x11f   : > { %v2747_v48 = vpop.f32.mrf.mxu0  ;;  %v2763_v49 = vpop.f32.mrf.mxu1 }
 0x120   : > { %v2411_v50 = vpack.c.bf16 %v2747_v48, %v2746_v44  ;;  %v2451_v51 = vpack.c.bf16 %v2763_v49, %v2762_v45 }
 0x121   : > { %v554_v52 = vpop.f32.mrf.mxu0  ;;  %v618_v53 = vpop.f32.mrf.mxu1 }
 0x122   : > { %2587 = vst [vmem:[#allocation2 + $0x28] sm:$0xff] %v2411_v50   ;;  %2595 = vst [vmem:[#allocation2 + $0x68] sm:$0xff] %v2451_v51   ;;  %v2406_v54 = vpack.c.bf16 %v554_v52, %v551_v46  ;;  %v2446_v55 = vpack.c.bf16 %v618_v53, %v615_v47 }
 0x123   : > { %v2750_v56 = vpop.f32.mrf.mxu0  ;;  %v2766_v57 = vpop.f32.mrf.mxu1 }
 0x124   : > { %2586 = vst [vmem:[#allocation2 + $0x20] sm:$0xff] %v2406_v54   ;;  %2594 = vst [vmem:[#allocation2 + $0x60] sm:$0xff] %v2446_v55  }
 0x125   : > { %v567_v58 = vpop.f32.mrf.mxu0  ;;  %v631_v59 = vpop.f32.mrf.mxu1 }
 0x127   : > { %v2751_v60 = vpop.f32.mrf.mxu0  ;;  %v2767_v61 = vpop.f32.mrf.mxu1 }
 0x128   : > { %v2421_v62 = vpack.c.bf16 %v2751_v60, %v2750_v56  ;;  %v2461_v63 = vpack.c.bf16 %v2767_v61, %v2766_v57 }
 0x129   : > { %v570_v0 = vpop.f32.mrf.mxu0  ;;  %v634_v1 = vpop.f32.mrf.mxu1 }
 0x12a   : > { %2589 = vst [vmem:[#allocation2 + $0x38] sm:$0xff] %v2421_v62   ;;  %2597 = vst [vmem:[#allocation2 + $0x78] sm:$0xff] %v2461_v63   ;;  %v2416_v2 = vpack.c.bf16 %v570_v0, %v567_v58  ;;  %v2456_v3 = vpack.c.bf16 %v634_v1, %v631_v59 }
 0x12c   : > { %2588 = vst [vmem:[#allocation2 + $0x30] sm:$0xff] %v2416_v2   ;;  %2596 = vst [vmem:[#allocation2 + $0x70] sm:$0xff] %v2456_v3  }
 0x12d PF: > { %p806_p8 = scmp.eq.s32.totalorder %s3199_s25, 1 }
 0x12f   : > { %p807_p5 = pnand %p806_p8, %p287_p1 }
 0x131   : > { %810 = sbr.rel (%p807_p5) target bundleno = 569 (0x239), region = 56 }
 0x136   : > { %v2959_v4 = vld [vmem:[%s3809_s4 + $0x38] sm:$0xff]   ;;  %v2960_v5 = vld [vmem:[%s3809_s4 + $0x30] sm:$0xff]   ;;  %v2961_v6 = vld [vmem:[%s3809_s4 + $0x28] sm:$0xff]  }
 0x137   : > { %2768 = vmatprep.subr.bf16.mxu0 %v2959_v4  ;;  %2824 = vmatprep.subr.bf16.mxu1 %v2959_v4  ;;  %v2962_v7 = vld [vmem:[%s3809_s4 + $0x20] sm:$0xff]   ;;  %v2963_v10 = vld [vmem:[%s3809_s4 + $0x18] sm:$0xff]   ;;  %v2964_v11 = vld [vmem:[%s3809_s4 + $0x10] sm:$0xff]  }
 0x138   : > { %2769 = vmatpush3.bf16.msra.mxu0 %v2959_v4  ;;  %2832 = vmatpush3.bf16.msra.mxu1 %v2959_v4  ;;  %v2967_v8 = vld [vmem:[#allocation3] sm:$0xff]   ;;  %v2965_v12 = vld [vmem:[%s3809_s4 + $0x8] sm:$0xff]   ;;  %v2971_v16 = vld [vmem:[#allocation3 + $0x10] sm:$0xff]  }
 0x139   : > { %2770 = vmatprep.subr.bf16.mxu0 %v2960_v5  ;;  %2825 = vmatprep.subr.bf16.mxu1 %v2960_v5  ;;  %v2968_v9 = vld [vmem:[#allocation3 + $0x40] sm:$0xff]   ;;  %v2969_v14 = vld [vmem:[#allocation3 + $0x8] sm:$0xff]   ;;  %v2972_v17 = vld [vmem:[#allocation3 + $0x50] sm:$0xff]  }
 0x13a   : > { %2784 = vmatprep.mubr.bf16.mxu0 %v2967_v8  ;;  %2800 = vmatprep.mubr.bf16.mxu1 %v2968_v9  ;;  %v2966_v13 = vld [vmem:[%s3809_s4] sm:$0xff]   ;;  %v2970_v15 = vld [vmem:[#allocation3 + $0x48] sm:$0xff]   ;;  %v2973_v18 = vld [vmem:[#allocation3 + $0x18] sm:$0xff]  }
 0x13b   : > { %v2974_v19 = vld [vmem:[#allocation3 + $0x58] sm:$0xff]   ;;  %v2975_v20 = vld [vmem:[#allocation3 + $0x20] sm:$0xff]   ;;  %v2977_v22 = vld [vmem:[#allocation3 + $0x28] sm:$0xff]  }
 0x13c   : > { %2771 = vmatpush3.bf16.msra.mxu0 %v2960_v5  ;;  %2833 = vmatpush3.bf16.msra.mxu1 %v2960_v5  ;;  %v2976_v21 = vld [vmem:[#allocation3 + $0x60] sm:$0xff]   ;;  %v2978_v23 = vld [vmem:[#allocation3 + $0x68] sm:$0xff]   ;;  %v2979_v24 = vld [vmem:[#allocation3 + $0x30] sm:$0xff]  }
 0x13d   : > { %2772 = vmatprep.subr.bf16.mxu0 %v2961_v6  ;;  %2826 = vmatprep.subr.bf16.mxu1 %v2961_v6  ;;  %v2980_v25 = vld [vmem:[#allocation3 + $0x70] sm:$0xff]   ;;  %v2981_v26 = vld [vmem:[#allocation3 + $0x38] sm:$0xff]  }
 0x13e   : > { %v2982_v27 = vld [vmem:[#allocation3 + $0x78] sm:$0xff]  }
 0x140   : > { %2773 = vmatpush3.bf16.msra.mxu0 %v2961_v6  ;;  %2834 = vmatpush3.bf16.msra.mxu1 %v2961_v6 }
 0x141   : > { %2774 = vmatprep.subr.bf16.mxu0 %v2962_v7  ;;  %2827 = vmatprep.subr.bf16.mxu1 %v2962_v7 }
 0x144   : > { %2775 = vmatpush3.bf16.msra.mxu0 %v2962_v7  ;;  %2835 = vmatpush3.bf16.msra.mxu1 %v2962_v7 }
 0x145   : > { %2776 = vmatprep.subr.bf16.mxu0 %v2963_v10  ;;  %2828 = vmatprep.subr.bf16.mxu1 %v2963_v10 }
 0x148   : > { %2777 = vmatpush3.bf16.msra.mxu0 %v2963_v10  ;;  %2836 = vmatpush3.bf16.msra.mxu1 %v2963_v10 }
 0x149   : > { %2778 = vmatprep.subr.bf16.mxu0 %v2964_v11  ;;  %2829 = vmatprep.subr.bf16.mxu1 %v2964_v11 }
 0x14c   : > { %2779 = vmatpush3.bf16.msra.mxu0 %v2964_v11  ;;  %2837 = vmatpush3.bf16.msra.mxu1 %v2964_v11 }
 0x14d   : > { %2780 = vmatprep.subr.bf16.mxu0 %v2965_v12  ;;  %2830 = vmatprep.subr.bf16.mxu1 %v2965_v12 }
 0x150   : > { %2781 = vmatpush3.bf16.msra.mxu0 %v2965_v12  ;;  %2838 = vmatpush3.bf16.msra.mxu1 %v2965_v12 }
 0x151   : > { %2782 = vmatprep.subr.bf16.mxu0 %v2966_v13  ;;  %2831 = vmatprep.subr.bf16.mxu1 %v2966_v13 }
 0x154   : > { %2783 = vmatpush3.bf16.msra.mxu0 %v2966_v13  ;;  %2839 = vmatpush3.bf16.msra.mxu1 %v2966_v13 }
 0x157   : > { %2785 = vmatmul.mubr.bf16.vlgmr.msra.gmra.mxu0 %v2969_v14  ;;  %2801 = vmatmul.mubr.bf16.vlgmr.msra.gmra.mxu1 %v2970_v15 }
 0x158   : > { %2788 = vmatprep.mubr.bf16.mxu0 %v2971_v16  ;;  %2804 = vmatprep.mubr.bf16.mxu1 %v2972_v17 }
 0x15f   : > { %2789 = vmatmul.mubr.bf16.gmra.mxu0 %v2973_v18  ;;  %2805 = vmatmul.mubr.bf16.gmra.mxu1 %v2974_v19 }
 0x160   : > { %2792 = vmatprep.mubr.bf16.mxu0 %v2975_v20  ;;  %2808 = vmatprep.mubr.bf16.mxu1 %v2976_v21 }
 0x167   : > { %2793 = vmatmul.mubr.bf16.gmra.mxu0 %v2977_v22  ;;  %2809 = vmatmul.mubr.bf16.gmra.mxu1 %v2978_v23 }
 0x168   : > { %2796 = vmatprep.mubr.bf16.mxu0 %v2979_v24  ;;  %2812 = vmatprep.mubr.bf16.mxu1 %v2980_v25 }
 0x16f   : > { %2797 = vmatmul.mubr.bf16.gmra.mxu0 %v2981_v26  ;;  %2813 = vmatmul.mubr.bf16.gmra.mxu1 %v2982_v27 }
 0x217   : > { %v2786_v28 = vpop.f32.mrf.mxu0  ;;  %v2802_v29 = vpop.f32.mrf.mxu1 }
 0x219   : > { %v1037_v30 = vpop.f32.mrf.mxu0  ;;  %v1101_v31 = vpop.f32.mrf.mxu1 }
 0x21b   : > { %v2787_v32 = vpop.f32.mrf.mxu0  ;;  %v2803_v33 = vpop.f32.mrf.mxu1 }
 0x21c   : > { %v2471_v34 = vpack.c.bf16 %v2787_v32, %v2786_v28  ;;  %v2511_v35 = vpack.c.bf16 %v2803_v33, %v2802_v29 }
 0x21d   : > { %v1040_v36 = vpop.f32.mrf.mxu0  ;;  %v1104_v37 = vpop.f32.mrf.mxu1 }
 0x21e   : > { %2598 = vst [vmem:[#allocation2 + $0x8] sm:$0xff] %v2471_v34   ;;  %2606 = vst [vmem:[#allocation2 + $0x48] sm:$0xff] %v2511_v35   ;;  %v2466_v38 = vpack.c.bf16 %v1040_v36, %v1037_v30  ;;  %v2506_v39 = vpack.c.bf16 %v1104_v37, %v1101_v31 }
 0x21f   : > { %v2790_v40 = vpop.f32.mrf.mxu0  ;;  %v2806_v41 = vpop.f32.mrf.mxu1 }
 0x220   : > { %2467 = vst [vmem:[#allocation2] sm:$0xff] %v2466_v38   ;;  %2605 = vst [vmem:[#allocation2 + $0x40] sm:$0xff] %v2506_v39  }
 0x221   : > { %v1053_v42 = vpop.f32.mrf.mxu0  ;;  %v1117_v43 = vpop.f32.mrf.mxu1 }
 0x223   : > { %v2791_v44 = vpop.f32.mrf.mxu0  ;;  %v2807_v45 = vpop.f32.mrf.mxu1 }
 0x224   : > { %v2481_v46 = vpack.c.bf16 %v2791_v44, %v2790_v40  ;;  %v2521_v47 = vpack.c.bf16 %v2807_v45, %v2806_v41 }
 0x225   : > { %v1056_v48 = vpop.f32.mrf.mxu0  ;;  %v1120_v49 = vpop.f32.mrf.mxu1 }
 0x226   : > { %2600 = vst [vmem:[#allocation2 + $0x18] sm:$0xff] %v2481_v46   ;;  %2608 = vst [vmem:[#allocation2 + $0x58] sm:$0xff] %v2521_v47   ;;  %v2476_v50 = vpack.c.bf16 %v1056_v48, %v1053_v42  ;;  %v2516_v51 = vpack.c.bf16 %v1120_v49, %v1117_v43 }
 0x227   : > { %v2794_v52 = vpop.f32.mrf.mxu0  ;;  %v2810_v53 = vpop.f32.mrf.mxu1 }
 0x228   : > { %2599 = vst [vmem:[#allocation2 + $0x10] sm:$0xff] %v2476_v50   ;;  %2607 = vst [vmem:[#allocation2 + $0x50] sm:$0xff] %v2516_v51  }
 0x229   : > { %v1069_v54 = vpop.f32.mrf.mxu0  ;;  %v1133_v55 = vpop.f32.mrf.mxu1 }
 0x22b   : > { %v2795_v56 = vpop.f32.mrf.mxu0  ;;  %v2811_v57 = vpop.f32.mrf.mxu1 }
 0x22c   : > { %v2491_v58 = vpack.c.bf16 %v2795_v56, %v2794_v52  ;;  %v2531_v59 = vpack.c.bf16 %v2811_v57, %v2810_v53 }
 0x22d   : > { %v1072_v60 = vpop.f32.mrf.mxu0  ;;  %v1136_v61 = vpop.f32.mrf.mxu1 }
 0x22e   : > { %2602 = vst [vmem:[#allocation2 + $0x28] sm:$0xff] %v2491_v58   ;;  %2610 = vst [vmem:[#allocation2 + $0x68] sm:$0xff] %v2531_v59   ;;  %v2486_v62 = vpack.c.bf16 %v1072_v60, %v1069_v54  ;;  %v2526_v63 = vpack.c.bf16 %v1136_v61, %v1133_v55 }
 0x22f   : > { %v2798_v0 = vpop.f32.mrf.mxu0  ;;  %v2814_v1 = vpop.f32.mrf.mxu1 }
 0x230   : > { %2601 = vst [vmem:[#allocation2 + $0x20] sm:$0xff] %v2486_v62   ;;  %2609 = vst [vmem:[#allocation2 + $0x60] sm:$0xff] %v2526_v63  }
 0x231   : > { %v1085_v2 = vpop.f32.mrf.mxu0  ;;  %v1149_v3 = vpop.f32.mrf.mxu1 }
 0x233   : > { %v2799_v4 = vpop.f32.mrf.mxu0  ;;  %v2815_v5 = vpop.f32.mrf.mxu1 }
 0x234   : > { %v2501_v6 = vpack.c.bf16 %v2799_v4, %v2798_v0  ;;  %v2541_v7 = vpack.c.bf16 %v2815_v5, %v2814_v1 }
 0x235   : > { %v1088_v8 = vpop.f32.mrf.mxu0  ;;  %v1152_v9 = vpop.f32.mrf.mxu1 }
 0x236   : > { %2604 = vst [vmem:[#allocation2 + $0x38] sm:$0xff] %v2501_v6   ;;  %2612 = vst [vmem:[#allocation2 + $0x78] sm:$0xff] %v2541_v7   ;;  %v2496_v10 = vpack.c.bf16 %v1088_v8, %v1085_v2  ;;  %v2536_v11 = vpack.c.bf16 %v1152_v9, %v1149_v3 }
 0x238   : > { %2603 = vst [vmem:[#allocation2 + $0x30] sm:$0xff] %v2496_v10   ;;  %2611 = vst [vmem:[#allocation2 + $0x70] sm:$0xff] %v2536_v11  }
 0x239 PF: > { %v2987_v16 = vld [vmem:[#allocation2 + $0x68] sm:$0xff]   ;;  %v2989_v18 = vld [vmem:[#allocation2 + $0x60] sm:$0xff]   ;;  %v2991_v20 = vld [vmem:[#allocation2 + $0x58] sm:$0xff]   ;;  %p2273_p6 = scmp.ne.s32.totalorder %s3199_s25, 0 }
 0x23a   : > { %v2988_v17 = vld [vmem:[#allocation2 + $0x28] sm:$0xff]   ;;  %v2990_v19 = vld [vmem:[#allocation2 + $0x20] sm:$0xff]   ;;  %v2992_v21 = vld [vmem:[#allocation2 + $0x18] sm:$0xff]   ;;  %s2275_s29 = sshll.u32 (!%p2273_p6), %s3195_s24, 7 }
 0x23b   : > { %v2993_v22 = vld [vmem:[#allocation2 + $0x50] sm:$0xff]   ;;  %v3001_v23 = vld [vmem:[%s3362_s20 + $0x4] ss:$8 sps:$4 sm:$0xff]   ;;  %v2999_v30 = vld [vmem:[%s3362_s20] ss:$8 sps:$4 sm:$0xff]   ;;  %s3532_s30 = sshra.s32 (!%p2273_p6), %s2275_s29, 3 }
 0x23c   : > { %v3004_v24 = vld [vmem:[%s3362_s20 + $0x44] ss:$8 sps:$4 sm:$0xff]   ;;  %v2994_v25 = vld [vmem:[#allocation2 + $0x10] sm:$0xff]   ;;  %1580 = vmatprep.mubr.bf16.mxu0 %v3001_v23  ;;  %v3002_v31 = vld [vmem:[%s3362_s20 + $0x40] ss:$8 sps:$4 sm:$0xff]   ;;  %s2292_s13 = sshll.u32 (!%p2273_p6), %s3532_s30, 2 }
 0x23d   : > { %v2983_v12 = vld [vmem:[#allocation2 + $0x78] sm:$0xff]   ;;  %v2995_v26 = vld [vmem:[#allocation2 + $0x48] sm:$0xff]   ;;  %1612 = vmatprep.mubr.bf16.mxu1 %v3004_v24  ;;  %v2997_v28 = vld [vmem:[#allocation2 + $0x40] sm:$0xff]   ;;  %s1755_s19 = scalar_lea.vmem (!%p2273_p6), [#allocation3], %s2292_s13 }
 0x23e   : > { %v2984_v13 = vld [vmem:[#allocation2 + $0x38] sm:$0xff]   ;;  %2664 = vmatprep.subr.bf16.mxu0 %v2983_v12  ;;  %2840 = vmatprep.subr.bf16.mxu1 %v2983_v12  ;;  %v2996_v27 = vld [vmem:[#allocation2 + $0x8] sm:$0xff]   ;;  %v2998_v29 = vld [vmem:[#allocation2] sm:$0xff]  }
 0x23f   : > { %v2985_v14 = vld [vmem:[#allocation2 + $0x70] sm:$0xff]   ;;  %2665 = vmatpush3.bf16.msra.mxu0 %v2984_v13  ;;  %2848 = vmatpush3.bf16.msra.mxu1 %v2984_v13  ;;  %v3011_v36 = vld [vmem:[%s3362_s20 + $0x24] ss:$8 sps:$4 sm:$0xff]   ;;  %v3015_v38 = vld [vmem:[%s3362_s20 + $0x20] ss:$8 sps:$4 sm:$0xff]  }
 0x240   : > { %v2986_v15 = vld [vmem:[#allocation2 + $0x30] sm:$0xff]   ;;  %2666 = vmatprep.subr.bf16.mxu0 %v2985_v14  ;;  %2841 = vmatprep.subr.bf16.mxu1 %v2985_v14  ;;  %v3013_v37 = vld [vmem:[%s3362_s20 + $0x64] ss:$8 sps:$4 sm:$0xff]   ;;  %v3016_v39 = vld [vmem:[%s3362_s20 + $0x60] ss:$8 sps:$4 sm:$0xff]  }
 0x241   : > { %v3005_v32 = vld [vmem:[%s3362_s20 + $0x14] ss:$8 sps:$4 sm:$0xff]   ;;  %v3009_v34 = vld [vmem:[%s3362_s20 + $0x10] ss:$8 sps:$4 sm:$0xff]  }
 0x242   : > { %v3007_v33 = vld [vmem:[%s3362_s20 + $0x54] ss:$8 sps:$4 sm:$0xff]   ;;  %v3010_v35 = vld [vmem:[%s3362_s20 + $0x50] ss:$8 sps:$4 sm:$0xff]  }
 0x243   : > { %2667 = vmatpush3.bf16.msra.mxu0 %v2986_v15  ;;  %2849 = vmatpush3.bf16.msra.mxu1 %v2986_v15  ;;  %v3017_v40 = vld [vmem:[%s3362_s20 + $0x34] ss:$8 sps:$4 sm:$0xff]   ;;  %v3021_v42 = vld [vmem:[%s3362_s20 + $0x30] ss:$8 sps:$4 sm:$0xff]  }
 0x244   : > { %2668 = vmatprep.subr.bf16.mxu0 %v2987_v16  ;;  %2842 = vmatprep.subr.bf16.mxu1 %v2987_v16  ;;  %v3019_v41 = vld [vmem:[%s3362_s20 + $0x74] ss:$8 sps:$4 sm:$0xff]   ;;  %v3022_v43 = vld [vmem:[%s3362_s20 + $0x70] ss:$8 sps:$4 sm:$0xff]  }
 0x247   : > { %2669 = vmatpush3.bf16.msra.mxu0 %v2988_v17  ;;  %2850 = vmatpush3.bf16.msra.mxu1 %v2988_v17 }
 0x248   : > { %2670 = vmatprep.subr.bf16.mxu0 %v2989_v18  ;;  %2843 = vmatprep.subr.bf16.mxu1 %v2989_v18 }
 0x24b   : > { %2671 = vmatpush3.bf16.msra.mxu0 %v2990_v19  ;;  %2851 = vmatpush3.bf16.msra.mxu1 %v2990_v19 }
 0x24c   : > { %2672 = vmatprep.subr.bf16.mxu0 %v2991_v20  ;;  %2844 = vmatprep.subr.bf16.mxu1 %v2991_v20 }
 0x24f   : > { %2673 = vmatpush3.bf16.msra.mxu0 %v2992_v21  ;;  %2852 = vmatpush3.bf16.msra.mxu1 %v2992_v21 }
 0x250   : > { %2674 = vmatprep.subr.bf16.mxu0 %v2993_v22  ;;  %2845 = vmatprep.subr.bf16.mxu1 %v2993_v22 }
 0x253   : > { %2675 = vmatpush3.bf16.msra.mxu0 %v2994_v25  ;;  %2853 = vmatpush3.bf16.msra.mxu1 %v2994_v25 }
 0x254   : > { %2676 = vmatprep.subr.bf16.mxu0 %v2995_v26  ;;  %2846 = vmatprep.subr.bf16.mxu1 %v2995_v26 }
 0x257   : > { %2677 = vmatpush3.bf16.msra.mxu0 %v2996_v27  ;;  %2854 = vmatpush3.bf16.msra.mxu1 %v2996_v27 }
 0x258   : > { %2678 = vmatprep.subr.bf16.mxu0 %v2997_v28  ;;  %2847 = vmatprep.subr.bf16.mxu1 %v2997_v28 }
 0x25b   : > { %2679 = vmatpush3.bf16.msra.mxu0 %v2998_v29  ;;  %2855 = vmatpush3.bf16.msra.mxu1 %v2998_v29 }
 0x25e   : > { %1581 = vmatmul.mubr.bf16.vlgmr.msra.gmra.mxu0 %v2999_v30  ;;  %1613 = vmatmul.mubr.bf16.vlgmr.msra.gmra.mxu1 %v3002_v31 }
 0x25f   : > { %1588 = vmatprep.mubr.bf16.mxu0 %v3005_v32  ;;  %1620 = vmatprep.mubr.bf16.mxu1 %v3007_v33 }
 0x266   : > { %1589 = vmatmul.mubr.bf16.gmra.mxu0 %v3009_v34  ;;  %1621 = vmatmul.mubr.bf16.gmra.mxu1 %v3010_v35 }
 0x267   : > { %1596 = vmatprep.mubr.bf16.mxu0 %v3011_v36  ;;  %1628 = vmatprep.mubr.bf16.mxu1 %v3013_v37 }
 0x26e   : > { %1597 = vmatmul.mubr.bf16.gmra.mxu0 %v3015_v38  ;;  %1629 = vmatmul.mubr.bf16.gmra.mxu1 %v3016_v39 }
 0x26f   : > { %1604 = vmatprep.mubr.bf16.mxu0 %v3017_v40  ;;  %1636 = vmatprep.mubr.bf16.mxu1 %v3019_v41 }
 0x276   : > { %1605 = vmatmul.mubr.bf16.gmra.mxu0 %v3021_v42  ;;  %1637 = vmatmul.mubr.bf16.gmra.mxu1 %v3022_v43 }
 0x31e   : > { %v2680_v44 = vpop.f32.mrf.mxu0  ;;  %v2704_v45 = vpop.f32.mrf.mxu1 }
 0x320   : > { %v2681_v46 = vpop.f32.mrf.mxu0  ;;  %v2705_v47 = vpop.f32.mrf.mxu1 }
 0x321   : > { %v3493_v48 = vadd.f32 %v2681_v46, %v2680_v44  ;;  %v3495_v49 = vadd.f32 %v2705_v47, %v2704_v45 }
 0x322   : > { %v2683_v50 = vpop.f32.mrf.mxu0  ;;  %v2707_v51 = vpop.f32.mrf.mxu1 }
 0x324   : > { %v2684_v52 = vpop.f32.mrf.mxu0  ;;  %v2708_v53 = vpop.f32.mrf.mxu1 }
 0x325   : > { %v3497_v54 = vadd.f32 %v2684_v52, %v2683_v50  ;;  %v3499_v55 = vadd.f32 %v2708_v53, %v2707_v51 }
 0x326   : > { %v2686_v56 = vpop.f32.mrf.mxu0  ;;  %v2710_v57 = vpop.f32.mrf.mxu1 }
 0x328   : > { %v2687_v58 = vpop.f32.mrf.mxu0  ;;  %v2711_v59 = vpop.f32.mrf.mxu1 }
 0x329   : > { %v3501_v60 = vadd.f32 %v2687_v58, %v2686_v56  ;;  %v3503_v61 = vadd.f32 %v2711_v59, %v2710_v57 }
 0x32a   : > { %v2689_v62 = vpop.f32.mrf.mxu0  ;;  %v2713_v63 = vpop.f32.mrf.mxu1 }
 0x32c   : > { %v2690_v0 = vpop.f32.mrf.mxu0  ;;  %v2714_v1 = vpop.f32.mrf.mxu1 }
 0x32d   : > { %v3505_v2 = vadd.f32 %v2690_v0, %v2689_v62  ;;  %v3507_v3 = vadd.f32 %v2714_v1, %v2713_v63 }
 0x32e   : > { %v2692_v4 = vpop.f32.mrf.mxu0  ;;  %v2716_v5 = vpop.f32.mrf.mxu1 }
 0x330   : > { %v2693_v6 = vpop.f32.mrf.mxu0  ;;  %v2717_v7 = vpop.f32.mrf.mxu1 }
 0x331   : > { %v3509_v8 = vadd.f32 %v2693_v6, %v2692_v4  ;;  %v3511_v9 = vadd.f32 %v2717_v7, %v2716_v5 }
 0x332   : > { %v2695_v10 = vpop.f32.mrf.mxu0  ;;  %v2719_v11 = vpop.f32.mrf.mxu1 }
 0x334   : > { %v2696_v12 = vpop.f32.mrf.mxu0  ;;  %v2720_v13 = vpop.f32.mrf.mxu1 }
 0x335   : > { %v3513_v14 = vadd.f32 %v2696_v12, %v2695_v10  ;;  %v3515_v15 = vadd.f32 %v2720_v13, %v2719_v11 }
 0x336   : > { %v2698_v16 = vpop.f32.mrf.mxu0  ;;  %v2722_v17 = vpop.f32.mrf.mxu1 }
 0x338   : > { %v2699_v18 = vpop.f32.mrf.mxu0  ;;  %v2723_v19 = vpop.f32.mrf.mxu1 }
 0x339   : > { %v3517_v20 = vadd.f32 %v2699_v18, %v2698_v16  ;;  %v3519_v21 = vadd.f32 %v2723_v19, %v2722_v17  ;;  %1647 = sbr.rel (%p2273_p6) target bundleno = 846 (0x34e), region = 60 }
 0x33a   : > { %v2701_v22 = vpop.f32.mrf.mxu0  ;;  %v2725_v23 = vpop.f32.mrf.mxu1 }
 0x33c   : > { %v2702_v24 = vpop.f32.mrf.mxu0  ;;  %v2726_v25 = vpop.f32.mrf.mxu1 }
 0x33d   : > { %v3521_v26 = vadd.f32 %v2702_v24, %v2701_v22  ;;  %v3523_v27 = vadd.f32 %v2726_v25, %v2725_v23 }
 0x33e   : > { %v2274_v28 = vld [vmem:[%s3808_s3] ss:$0 sm:$0xff]  ;;  %v3216_v33 = vmov 0.0  }
 0x33f   : > { %v1655_v29 = vadd.f32 %v3493_v48, %v2274_v28  ;;  %v1656_v30 = vadd.f32 %v3497_v54, %v2274_v28  ;;  %v1657_v31 = vadd.f32 %v3501_v60, %v2274_v28  ;;  %v1658_v32 = vadd.f32 %v3505_v2, %v2274_v28  ;;  %1772 = vst [vmem:[%s3372_s8] sm:$0xff] %v3216_v33 }
 0x340   : > { %1773 = vst [vmem:[%s3372_s8 + $0x8] sm:$0xff] %v3216_v33  ;;  %1774 = vst [vmem:[%s3372_s8 + $0x10] sm:$0xff] %v3216_v33  ;;  %v1659_v34 = vadd.f32 %v3509_v8, %v2274_v28  ;;  %v1660_v35 = vadd.f32 %v3513_v14, %v2274_v28  ;;  %v1661_v36 = vadd.f32 %v3517_v20, %v2274_v28 }
 0x341   : > { %1775 = vst [vmem:[%s3372_s8 + $0x18] sm:$0xff] %v3216_v33  ;;  %1776 = vst [vmem:[%s3372_s8 + $0x20] sm:$0xff] %v3216_v33  ;;  %v1662_v37 = vadd.f32 %v3521_v26, %v2274_v28  ;;  %v1671_v38 = vmax.f32 %v1655_v29, 0.0  ;;  %v1672_v39 = vmax.f32 %v1656_v30, 0.0  ;;  %v1673_v40 = vmax.f32 %v1657_v31, 0.0 }
 0x342   : > { %1777 = vst [vmem:[%s3372_s8 + $0x28] sm:$0xff] %v3216_v33  ;;  %1778 = vst [vmem:[%s3372_s8 + $0x30] sm:$0xff] %v3216_v33  ;;  %v1674_v41 = vmax.f32 %v1658_v32, 0.0  ;;  %v1675_v42 = vmax.f32 %v1659_v34, 0.0  ;;  %v1676_v43 = vmax.f32 %v1660_v35, 0.0  ;;  %v1677_v44 = vmax.f32 %v1661_v36, 0.0 }
 0x343   : > { %1779 = vst [vmem:[%s3372_s8 + $0x38] sm:$0xff] %v3216_v33  ;;  %1780 = vst [vmem:[%s3372_s8 + $0x40] sm:$0xff] %v3216_v33  ;;  %v1678_v45 = vmax.f32 %v1662_v37, 0.0  ;;  %v2546_v46 = vpack.c.bf16 %v1672_v39, %v1671_v38  ;;  %v1663_v50 = vadd.f32 %v3495_v49, %v2274_v28  ;;  %v1664_v51 = vadd.f32 %v3499_v55, %v2274_v28 }
 0x344   : > { %1781 = vst [vmem:[%s3372_s8 + $0x48] sm:$0xff] %v3216_v33  ;;  %1782 = vst [vmem:[%s3372_s8 + $0x50] sm:$0xff] %v3216_v33  ;;  %v2551_v47 = vpack.c.bf16 %v1674_v41, %v1673_v40  ;;  %v2556_v52 = vpack.c.bf16 %v1676_v43, %v1675_v42  ;;  %v1665_v56 = vadd.f32 %v3503_v61, %v2274_v28 }
 0x345   : > { %1783 = vst [vmem:[%s3372_s8 + $0x58] sm:$0xff] %v3216_v33  ;;  %1784 = vst [vmem:[%s3372_s8 + $0x60] sm:$0xff] %v3216_v33  ;;  %v2561_v53 = vpack.c.bf16 %v1678_v45, %v1677_v44  ;;  %v1666_v57 = vadd.f32 %v3507_v3, %v2274_v28  ;;  %v1679_v58 = vmax.f32 %v1663_v50, 0.0  ;;  %v1680_v59 = vmax.f32 %v1664_v51, 0.0 }
 0x346   : > { %1785 = vst [vmem:[%s3372_s8 + $0x68] sm:$0xff] %v3216_v33  ;;  %1786 = vst [vmem:[%s3372_s8 + $0x70] sm:$0xff] %v3216_v33  ;;  %v1667_v62 = vadd.f32 %v3511_v9, %v2274_v28  ;;  %v1668_v63 = vadd.f32 %v3515_v15, %v2274_v28  ;;  %v1681_v0 = vmax.f32 %v1665_v56, 0.0  ;;  %v1669_v4 = vadd.f32 %v3519_v21, %v2274_v28 }
 0x347   : > { %1787 = vst [vmem:[%s3372_s8 + $0x78] sm:$0xff] %v3216_v33  ;;  %2547 = vst [vmem:[%s1755_s19] sm:$0xff] %v2546_v46   ;;  %v1682_v1 = vmax.f32 %v1666_v57, 0.0  ;;  %v1670_v5 = vadd.f32 %v3523_v27, %v2274_v28  ;;  %v2566_v6 = vpack.c.bf16 %v1680_v59, %v1679_v58 }
 0x348   : > { %2613 = vst [vmem:[%s1755_s19 + $0x8] sm:$0xff] %v2551_v47   ;;  %2614 = vst [vmem:[%s1755_s19 + $0x10] sm:$0xff] %v2556_v52   ;;  %v1683_v7 = vmax.f32 %v1667_v62, 0.0  ;;  %v1684_v10 = vmax.f32 %v1668_v63, 0.0  ;;  %v1685_v12 = vmax.f32 %v1669_v4, 0.0 }
 0x349   : > { %2615 = vst [vmem:[%s1755_s19 + $0x18] sm:$0xff] %v2561_v53   ;;  %v2571_v11 = vpack.c.bf16 %v1682_v1, %v1681_v0  ;;  %v1686_v13 = vmax.f32 %v1670_v5, 0.0  ;;  %2616 = vst [vmem:[%s1755_s19 + $0x20] sm:$0xff] %v2566_v6  }
 0x34a   : > { %v2576_v16 = vpack.c.bf16 %v1684_v10, %v1683_v7 }
 0x34b   : > { %2617 = vst [vmem:[%s1755_s19 + $0x28] sm:$0xff] %v2571_v11   ;;  %v2581_v17 = vpack.c.bf16 %v1686_v13, %v1685_v12 }
 0x34c   : > { %2618 = vst [vmem:[%s1755_s19 + $0x30] sm:$0xff] %v2576_v16  }
 0x34d   : > { %2619 = vst [vmem:[%s1755_s19 + $0x38] sm:$0xff] %v2581_v17  }
 0x34e PF: > { %p2293_p7 = scmp.ne.s32.totalorder %s3199_s25, 1 }
 0x350   : > { %1790 = sbr.rel (%p2293_p7) target bundleno = 1203 (0x4b3), region = 64 }
 0x355   : > { %v2294_v18 = vld [vmem:[%s3810_s5] ss:$0 sm:$0xff] }
 0x356   : > { %v3570_v19 = vadd.f32 %v3493_v48, %v2294_v18  ;;  %v3573_v22 = vadd.f32 %v3501_v60, %v2294_v18  ;;  %v3578_v23 = vadd.f32 %v3497_v54, %v2294_v18  ;;  %v3581_v24 = vadd.f32 %v3505_v2, %v2294_v18 }
 0x357   : > { %v3586_v48 = vadd.f32 %v3509_v8, %v2294_v18  ;;  %v3589_v60 = vadd.f32 %v3513_v14, %v2294_v18  ;;  %v3594_v54 = vadd.f32 %v3517_v20, %v2294_v18  ;;  %v3597_v2 = vadd.f32 %v3521_v26, %v2294_v18 }
 0x358   : > { %1814 = vmax.xlane.f32.xlu0 %v3570_v19  ;;  %1818 = vmax.xlane.f32.xlu1 %v3573_v22  ;;  %v3602_v8 = vadd.f32 %v3495_v49, %v2294_v18  ;;  %v3605_v14 = vadd.f32 %v3499_v55, %v2294_v18  ;;  %v3610_v20 = vadd.f32 %v3503_v61, %v2294_v18 }
 0x359   : > { %v3613_v25 = vadd.f32 %v3507_v3, %v2294_v18  ;;  %v3618_v49 = vadd.f32 %v3511_v9, %v2294_v18  ;;  %v3621_v55 = vadd.f32 %v3515_v15, %v2294_v18  ;;  %v3626_v61 = vadd.f32 %v3519_v21, %v2294_v18 }
 0x35a   : > { %v3629_v3 = vadd.f32 %v3523_v27, %v2294_v18 }
 0x35c   : > { %1816 = vmax.xlane.f32.xlu0 %v3578_v23  ;;  %1820 = vmax.xlane.f32.xlu1 %v3581_v24 }
 0x360   : > { %1822 = vmax.xlane.f32.xlu0 %v3586_v48  ;;  %1824 = vmax.xlane.f32.xlu1 %v3589_v60 }
 0x364   : > { %1826 = vmax.xlane.f32.xlu0 %v3594_v54  ;;  %1828 = vmax.xlane.f32.xlu1 %v3597_v2 }
 0x368   : > { %1830 = vmax.xlane.f32.xlu0 %v3602_v8  ;;  %1832 = vmax.xlane.f32.xlu1 %v3605_v14 }
 0x36c   : > { %1834 = vmax.xlane.f32.xlu0 %v3610_v20  ;;  %1836 = vmax.xlane.f32.xlu1 %v3613_v25 }
 0x370   : > { %1838 = vmax.xlane.f32.xlu0 %v3618_v49  ;;  %1840 = vmax.xlane.f32.xlu1 %v3621_v55 }
 0x374   : > { %1842 = vmax.xlane.f32.xlu0 %v3626_v61  ;;  %1844 = vmax.xlane.f32.xlu1 %v3629_v3 }
 0x3e1   : > { %v3633_v26 = vpop.xlane.xlu0 %1814  ;;  %v3635_v9 = vpop.xlane.xlu1 %1818 }
 0x3e2   : > { %v1846_v15 = vsub.f32 %v3570_v19, %v3633_v26  ;;  %v1848_v28 = vsub.f32 %v3573_v22, %v3635_v9 }
 0x3e4   : > { %v1862_v29 = vmul.f32 1.442695, %v1846_v15  ;;  %v1866_v21 = vmul.f32 1.442695, %v1848_v28 }
 0x3e5   : > { %v3641_v30 = vpop.xlane.xlu0 %1816  ;;  %v3643_v27 = vpop.xlane.xlu1 %1820 }
 0x3e6   : > { %3023 = vpow2.f32 %v1862_v29  ;;  %v1847_v31 = vsub.f32 %v3578_v23, %v3641_v30  ;;  %v1849_v32 = vsub.f32 %v3581_v24, %v3643_v27 }
 0x3e7   : > { %3025 = vpow2.f32 %v1866_v21 }
 0x3e8   : > { %v1864_v33 = vmul.f32 1.442695, %v1847_v31  ;;  %v1868_v34 = vmul.f32 1.442695, %v1849_v32 }
 0x3e9   : > { %v3649_v35 = vpop.xlane.xlu0 %1822  ;;  %v3651_v36 = vpop.xlane.xlu1 %1824 }
 0x3ea   : > { %3027 = vpow2.f32 %v1864_v33  ;;  %v1850_v37 = vsub.f32 %v3586_v48, %v3649_v35  ;;  %v1851_v38 = vsub.f32 %v3589_v60, %v3651_v36 }
 0x3eb   : > { %3029 = vpow2.f32 %v1868_v34 }
 0x3ec   : > { %v1870_v39 = vmul.f32 1.442695, %v1850_v37  ;;  %v1872_v40 = vmul.f32 1.442695, %v1851_v38 }
 0x3ed   : > { %v3657_v41 = vpop.xlane.xlu0 %1826  ;;  %v3659_v42 = vpop.xlane.xlu1 %1828 }
 0x3ee   : > { %3031 = vpow2.f32 %v1870_v39  ;;  %v1852_v43 = vsub.f32 %v3594_v54, %v3657_v41  ;;  %v1853_v44 = vsub.f32 %v3597_v2, %v3659_v42 }
 0x3ef   : > { %3033 = vpow2.f32 %v1872_v40 }
 0x3f0   : > { %v1874_v45 = vmul.f32 1.442695, %v1852_v43  ;;  %v1876_v46 = vmul.f32 1.442695, %v1853_v44 }
 0x3f1   : > { %v3665_v47 = vpop.xlane.xlu0 %1830  ;;  %v3667_v50 = vpop.xlane.xlu1 %1832 }
 0x3f2   : > { %3035 = vpow2.f32 %v1874_v45  ;;  %v1854_v51 = vsub.f32 %v3602_v8, %v3665_v47  ;;  %v1855_v52 = vsub.f32 %v3605_v14, %v3667_v50 }
 0x3f3   : > { %v3024_v53 = vpop.eup %3023  ;;  %3037 = vpow2.f32 %v1876_v46 }
 0x3f4   : > { %v1878_v56 = vmul.f32 1.442695, %v1854_v51  ;;  %1894 = vadd.xlane.f32.xlu0 %v3024_v53  ;;  %v1880_v57 = vmul.f32 1.442695, %v1855_v52  ;;  %v3026_v58 = vpop.eup %3025 }
 0x3f5   : > { %v3673_v59 = vpop.xlane.xlu0 %1834  ;;  %v3675_v62 = vpop.xlane.xlu1 %1836 }
 0x3f6   : > { %3039 = vpow2.f32 %v1878_v56  ;;  %v1856_v63 = vsub.f32 %v3610_v20, %v3673_v59  ;;  %v1857_v0 = vsub.f32 %v3613_v25, %v3675_v62 }
 0x3f7   : > { %v3028_v1 = vpop.eup %3027  ;;  %3041 = vpow2.f32 %v1880_v57 }
 0x3f8   : > { %v1882_v4 = vmul.f32 1.442695, %v1856_v63  ;;  %1898 = vadd.xlane.f32.xlu0 %v3026_v58  ;;  %1896 = vadd.xlane.f32.xlu1 %v3028_v1  ;;  %v1884_v5 = vmul.f32 1.442695, %v1857_v0  ;;  %v3030_v6 = vpop.eup %3029 }
 0x3f9   : > { %v3681_v7 = vpop.xlane.xlu0 %1838  ;;  %v3683_v10 = vpop.xlane.xlu1 %1840 }
 0x3fa   : > { %3043 = vpow2.f32 %v1882_v4  ;;  %v1858_v11 = vsub.f32 %v3618_v49, %v3681_v7  ;;  %v1859_v12 = vsub.f32 %v3621_v55, %v3683_v10 }
 0x3fb   : > { %v3032_v13 = vpop.eup %3031  ;;  %3045 = vpow2.f32 %v1884_v5 }
 0x3fc   : > { %v1886_v16 = vmul.f32 1.442695, %v1858_v11  ;;  %1900 = vadd.xlane.f32.xlu1 %v3030_v6  ;;  %1902 = vadd.xlane.f32.xlu0 %v3032_v13  ;;  %v1888_v17 = vmul.f32 1.442695, %v1859_v12  ;;  %v3034_v18 = vpop.eup %3033 }
 0x3fd   : > { %v3689_v15 = vpop.xlane.xlu0 %1842  ;;  %v3691_v28 = vpop.xlane.xlu1 %1844 }
 0x3fe   : > { %3047 = vpow2.f32 %v1886_v16  ;;  %v1860_v29 = vsub.f32 %v3626_v61, %v3689_v15  ;;  %v1861_v21 = vsub.f32 %v3629_v3, %v3691_v28 }
 0x3ff   : > { %v3036_v31 = vpop.eup %3035  ;;  %3049 = vpow2.f32 %v1888_v17 }
 0x400   : > { %v1890_v32 = vmul.f32 1.442695, %v1860_v29  ;;  %1904 = vadd.xlane.f32.xlu1 %v3034_v18  ;;  %1906 = vadd.xlane.f32.xlu0 %v3036_v31  ;;  %v1892_v33 = vmul.f32 1.442695, %v1861_v21  ;;  %v3038_v34 = vpop.eup %3037 }
 0x402   : > { %3051 = vpow2.f32 %v1890_v32 }
 0x403   : > { %v3040_v37 = vpop.eup %3039  ;;  %3053 = vpow2.f32 %v1892_v33 }
 0x404   : > { %1908 = vadd.xlane.f32.xlu1 %v3038_v34  ;;  %1910 = vadd.xlane.f32.xlu0 %v3040_v37  ;;  %v3042_v38 = vpop.eup %3041 }
 0x407   : > { %v3044_v39 = vpop.eup %3043 }
 0x408   : > { %1912 = vadd.xlane.f32.xlu1 %v3042_v38  ;;  %1914 = vadd.xlane.f32.xlu0 %v3044_v39  ;;  %v3046_v40 = vpop.eup %3045 }
 0x40b   : > { %v3048_v43 = vpop.eup %3047 }
 0x40c   : > { %1916 = vadd.xlane.f32.xlu1 %v3046_v40  ;;  %1918 = vadd.xlane.f32.xlu0 %v3048_v43  ;;  %v3050_v44 = vpop.eup %3049 }
 0x40f   : > { %v3052_v45 = vpop.eup %3051 }
 0x410   : > { %1920 = vadd.xlane.f32.xlu1 %v3050_v44  ;;  %1922 = vadd.xlane.f32.xlu0 %v3052_v45  ;;  %v3054_v46 = vpop.eup %3053 }
 0x414   : > { %1924 = vadd.xlane.f32.xlu1 %v3054_v46 }
 0x47d   : > { %v1895_v51 = vpop.xlane.xlu0 %1894 }
 0x47e   : > { %3055 = vlog2.f32 %v1895_v51 }
 0x481   : > { %v1897_v52 = vpop.xlane.xlu1 %1896  ;;  %v1899_v53 = vpop.xlane.xlu0 %1898 }
 0x482   : > { %3057 = vlog2.f32 %v1897_v52 }
 0x483   : > { %3059 = vlog2.f32 %v1899_v53 }
 0x485   : > { %v1901_v56 = vpop.xlane.xlu1 %1900  ;;  %v1903_v57 = vpop.xlane.xlu0 %1902 }
 0x486   : > { %3061 = vlog2.f32 %v1901_v56 }
 0x487   : > { %3063 = vlog2.f32 %v1903_v57 }
 0x489   : > { %v1905_v58 = vpop.xlane.xlu1 %1904  ;;  %v1907_v63 = vpop.xlane.xlu0 %1906 }
 0x48a   : > { %3065 = vlog2.f32 %v1905_v58 }
 0x48b   : > { %v3056_v0 = vpop.eup %3055  ;;  %3067 = vlog2.f32 %v1907_v63 }
 0x48c   : > { %v1927_v1 = vmul.f32 0.6931472, %v3056_v0 }
 0x48d   : > { %v1909_v4 = vpop.xlane.xlu1 %1908  ;;  %v1911_v5 = vpop.xlane.xlu0 %1910 }
 0x48e   : > { %v1958_v6 = vadd.f32 %v1927_v1, %v3633_v26  ;;  %3069 = vlog2.f32 %v1909_v4 }
 0x48f   : > { %v3058_v11 = vpop.eup %3057  ;;  %3071 = vlog2.f32 %v1911_v5 }
 0x490   : > { %v3060_v12 = vpop.eup %3059  ;;  %v1974_v13 = vsub.f32 %v3570_v19, %v1958_v6  ;;  %v1929_v16 = vmul.f32 0.6931472, %v3058_v11 }
 0x491   : > { %v1931_v17 = vmul.f32 0.6931472, %v3060_v12  ;;  %v1913_v18 = vpop.xlane.xlu1 %1912  ;;  %v1915_v29 = vpop.xlane.xlu0 %1914 }
 0x492   : > { %1990 = vst [vmem:[%s3372_s8] sm:$0xff] %v1974_v13  ;;  %v1959_v21 = vadd.f32 %v1929_v16, %v3641_v30  ;;  %3073 = vlog2.f32 %v1913_v18 }
 0x493   : > { %v3062_v31 = vpop.eup %3061  ;;  %v1960_v32 = vadd.f32 %v1931_v17, %v3635_v9  ;;  %3075 = vlog2.f32 %v1915_v29 }
 0x494   : > { %v3064_v26 = vpop.eup %3063  ;;  %v1975_v33 = vsub.f32 %v3578_v23, %v1959_v21  ;;  %v1933_v34 = vmul.f32 0.6931472, %v3062_v31 }
 0x495   : > { %v1976_v19 = vsub.f32 %v3573_v22, %v1960_v32  ;;  %v1935_v37 = vmul.f32 0.6931472, %v3064_v26  ;;  %v1917_v38 = vpop.xlane.xlu1 %1916  ;;  %v1919_v39 = vpop.xlane.xlu0 %1918 }
 0x496   : > { %1991 = vst [vmem:[%s3372_s8 + $0x8] sm:$0xff] %v1975_v33  ;;  %v1961_v40 = vadd.f32 %v1933_v34, %v3643_v27  ;;  %3077 = vlog2.f32 %v1917_v38 }
 0x497   : > { %v3066_v30 = vpop.eup %3065  ;;  %1992 = vst [vmem:[%s3372_s8 + $0x10] sm:$0xff] %v1976_v19  ;;  %v1962_v9 = vadd.f32 %v1935_v37, %v3649_v35  ;;  %3079 = vlog2.f32 %v1919_v39 }
 0x498   : > { %v3068_v43 = vpop.eup %3067  ;;  %v1977_v23 = vsub.f32 %v3581_v24, %v1961_v40  ;;  %v1937_v44 = vmul.f32 0.6931472, %v3066_v30 }
 0x499   : > { %v1978_v22 = vsub.f32 %v3586_v48, %v1962_v9  ;;  %v1939_v45 = vmul.f32 0.6931472, %v3068_v43  ;;  %v1921_v46 = vpop.xlane.xlu1 %1920  ;;  %v1923_v51 = vpop.xlane.xlu0 %1922 }
 0x49a   : > { %1993 = vst [vmem:[%s3372_s8 + $0x18] sm:$0xff] %v1977_v23  ;;  %v1963_v27 = vadd.f32 %v1937_v44, %v3651_v36  ;;  %3081 = vlog2.f32 %v1921_v46 }
 0x49b   : > { %v3070_v52 = vpop.eup %3069  ;;  %1994 = vst [vmem:[%s3372_s8 + $0x20] sm:$0xff] %v1978_v22  ;;  %v1964_v35 = vadd.f32 %v1939_v45, %v3657_v41  ;;  %3083 = vlog2.f32 %v1923_v51 }
 0x49c   : > { %v3072_v53 = vpop.eup %3071  ;;  %v1979_v24 = vsub.f32 %v3589_v60, %v1963_v27  ;;  %v1941_v56 = vmul.f32 0.6931472, %v3070_v52 }
 0x49d   : > { %v1980_v48 = vsub.f32 %v3594_v54, %v1964_v35  ;;  %v1943_v57 = vmul.f32 0.6931472, %v3072_v53  ;;  %v1925_v58 = vpop.xlane.xlu1 %1924 }
 0x49e   : > { %1995 = vst [vmem:[%s3372_s8 + $0x28] sm:$0xff] %v1979_v24  ;;  %v1965_v36 = vadd.f32 %v1941_v56, %v3659_v42  ;;  %3085 = vlog2.f32 %v1925_v58 }
 0x49f   : > { %v3074_v63 = vpop.eup %3073  ;;  %1996 = vst [vmem:[%s3372_s8 + $0x30] sm:$0xff] %v1980_v48  ;;  %v1966_v0 = vadd.f32 %v1943_v57, %v3665_v47 }
 0x4a0   : > { %v3076_v41 = vpop.eup %3075  ;;  %v1981_v1 = vsub.f32 %v3597_v2, %v1965_v36  ;;  %v1945_v60 = vmul.f32 0.6931472, %v3074_v63 }
 0x4a1   : > { %v1982_v4 = vsub.f32 %v3602_v8, %v1966_v0  ;;  %v1947_v54 = vmul.f32 0.6931472, %v3076_v41 }
 0x4a2   : > { %1997 = vst [vmem:[%s3372_s8 + $0x38] sm:$0xff] %v1981_v1  ;;  %v1967_v5 = vadd.f32 %v1945_v60, %v3667_v50 }
 0x4a3   : > { %v3078_v6 = vpop.eup %3077  ;;  %1998 = vst [vmem:[%s3372_s8 + $0x40] sm:$0xff] %v1982_v4  ;;  %v1968_v42 = vadd.f32 %v1947_v54, %v3673_v59 }
 0x4a4   : > { %v3080_v11 = vpop.eup %3079  ;;  %v1983_v47 = vsub.f32 %v3605_v14, %v1967_v5  ;;  %v1949_v12 = vmul.f32 0.6931472, %v3078_v6 }
 0x4a5   : > { %v1984_v2 = vsub.f32 %v3610_v20, %v1968_v42  ;;  %v1951_v13 = vmul.f32 0.6931472, %v3080_v11 }
 0x4a6   : > { %1999 = vst [vmem:[%s3372_s8 + $0x48] sm:$0xff] %v1983_v47  ;;  %v1969_v8 = vadd.f32 %v1949_v12, %v3675_v62 }
 0x4a7   : > { %v3082_v16 = vpop.eup %3081  ;;  %2000 = vst [vmem:[%s3372_s8 + $0x50] sm:$0xff] %v1984_v2  ;;  %v1970_v50 = vadd.f32 %v1951_v13, %v3681_v7 }
 0x4a8   : > { %v3084_v17 = vpop.eup %3083  ;;  %v1985_v59 = vsub.f32 %v3613_v25, %v1969_v8  ;;  %v1953_v18 = vmul.f32 0.6931472, %v3082_v16 }
 0x4a9   : > { %v1986_v14 = vsub.f32 %v3618_v49, %v1970_v50  ;;  %v1955_v29 = vmul.f32 0.6931472, %v3084_v17 }
 0x4aa   : > { %2001 = vst [vmem:[%s3372_s8 + $0x58] sm:$0xff] %v1985_v59  ;;  %v1971_v20 = vadd.f32 %v1953_v18, %v3683_v10 }
 0x4ab   : > { %v3086_v21 = vpop.eup %3085  ;;  %2002 = vst [vmem:[%s3372_s8 + $0x60] sm:$0xff] %v1986_v14  ;;  %v1972_v62 = vadd.f32 %v1955_v29, %v3689_v15 }
 0x4ac   : > { %v1987_v31 = vsub.f32 %v3621_v55, %v1971_v20  ;;  %v1957_v32 = vmul.f32 0.6931472, %v3086_v21 }
 0x4ad   : > { %v1988_v7 = vsub.f32 %v3626_v61, %v1972_v62 }
 0x4ae   : > { %2003 = vst [vmem:[%s3372_s8 + $0x68] sm:$0xff] %v1987_v31  ;;  %v1973_v25 = vadd.f32 %v1957_v32, %v3691_v28 }
 0x4af   : > { %2004 = vst [vmem:[%s3372_s8 + $0x70] sm:$0xff] %v1988_v7 }
 0x4b0   : > { %v1989_v26 = vsub.f32 %v3629_v3, %v1973_v25 }
 0x4b2   : > { %2005 = vst [vmem:[%s3372_s8 + $0x78] sm:$0xff] %v1989_v26 }
 0x4b3 PF: > { %s2382_s25 = sshll.u32 %s3195_s24, 11  ;;  %s2020_s9 = sshll.u32 %s3372_s8, 4  ;;  %s3752_s9 = int_to_ptr.vmem [resolvable:$true] %s2020_s9 }
 0x4b4   : > { %s3749_s18 = scalar_lea.hbm %s3811_s6, %s2382_s25  ;;  %s2007_s20 = scalar_lea.sflag [#allocation6], %s3358_s27 }
 0x4b5   : > { %s3115_s10 = scalar_lea.vmem %s3752_s9, 2048  ;;  %s3217_s29 = smov [#allocation7]  }
 0x4b6   : > { %p3116_p9 = scmp.ne.s32.totalorder %s3752_s9, %s3115_s10  ;;  %s3119_s30 = sshll.u32 %s3217_s29, 4  ;;  %s3120_s30 = int_to_ptr.vmem [resolvable:$false] %s3119_s30 }
 0x4b7   : > { %s3121_s24 = scalar_lea.vmem %s3120_s30, 4096  ;;  %p3122_p12 = scmp.lt.s32.totalorder %s3752_s9, %s3120_s30 }
 0x4b8   : > { %p3117_p10 = pnand %p3116_p9, %p3329_p11  ;;  %p3123_p2 = scmp.lt.s32.totalorder %s3121_s24, %s3115_s10 }
 0x4ba   : > { %p3118_p3 = pneg %p3117_p10  ;;  %p3124_p0 = por %p3123_p2, %p3122_p12 }
 0x4bc   : > { %p3125_p1 = pnand %p3124_p0, %p3118_p3 }
 0x4be   : > { %3128 = shalt.err (!%p3125_p1)
}
 0x4bf   : > { %s3129_s8 = scalar_lea.hbm %s3749_s18, 2048  ;;  %s3133_s17 = scalar_lea.hbm %s3811_s6, 4096 }
 0x4c0   : > { %p3130_p4 = scmp.ne.s32.totalorder %s3749_s18, %s3129_s8  ;;  %p3134_p6 = scmp.lt.s32.totalorder %s3749_s18, %s3811_s6 }
 0x4c1   : > { %p3135_p7 = scmp.lt.s32.totalorder %s3133_s17, %s3129_s8 }
 0x4c2   : > { %p3131_p8 = pnand %p3130_p4, %p3329_p11 }
 0x4c3   : > { %p3136_p9 = por %p3135_p7, %p3134_p6 }
 0x4c4   : > { %p3132_p5 = pneg %p3131_p8 }
 0x4c6   : > { %p3137_p10 = pnand %p3136_p9, %p3132_p5 }
 0x4c8   : > { %3140 = shalt.err (!%p3137_p10)
}
 0x4c9   : > { %s3218_s16 = smov 128   ;;  %s3219_s7 = smov 8  }
 0x4ca   : > { %2858 = dma.vmem_to_hbm [thread:$0]  (%p3329_p11), %s3752_s9, 2048, %s3749_s18, %s2007_s20, %s3218_s16, %s3218_s16, %s3219_s7  }
 0x4cb PF: > { %p2869_p3 = scmp.ge.s32.totalorder %s3211_s28, 2  ;;  %s2035_s10 = sand.u32 1, %s3183_s21  }
 0x4cc   : > { %s2036_s29 = scalar_lea.sflag [#allocation6], %s2035_s10 }
 0x4cd   : > { %p2865_p12 = pnand %p2869_p3, %p3334_p13 }
 0x4cf   : > { %p2866_p2 = pneg %p2865_p12 }
 0x4d1   : > { %3178 = dma.done.wait (%p2866_p2), %s2036_s29, 2048  }
 0x4d2   : > { %3180 = vsyncadd (%p2866_p2), %s2036_s29, 4294965248  ;;  %s22_s28 = sadd.s32 1, %s3211_s28   ;;  %s3822_s25 = sld [smem:[#allocation10_spill]] }
 0x4d3   : > { %p19_p0 = scmp.ge.s32.totalorder %s22_s28, 6   ;;  %s3823_s14 = sld [smem:[#allocation11_spill]] }
 0x4d4   : > { %s3824_s27 = sld [smem:[#allocation12_spill]]  ;;  %s3825_s21 = smov %s3187_s22 }
 0x4d5   : > { %s3826_s22 = smov %s3191_s23  ;;  %s3827_s23 = smov %s3320_s12 }
 0x4d6   : > { %s3828_s24 = smov %s3203_s26  ;;  %21 = sbr.rel (!%p19_p0) target bundleno = 7 (0x7), region = 106 }
 0x4d9   : > { %s3829_s26 = smov %s3823_s14 }
 0x4db   :  { %2041 = vsyncpa [#allocation5], 1 }
 0x4dc   :  { %2043 = vsyncpa [#allocation5 + $0x1], 1 }
 0x4dd   :  { %2044 = vsyncpa [#allocation6], 1 }
 0x4de   :  { %2046 = vsyncpa [#allocation6 + $0x1], 1 }

</bundles_post_ra>
